<compile_context>
chip_gen: v5e
topology: v5e:2x2
jax: 0.10.0
libtpu: 0.0.40
codegen_flags: <defaults>
</compile_context>

<pallas_src>
import jax
import jax.numpy as jnp
import numpy as np
from jax.experimental import pallas as pl
from jax.experimental.pallas import tpu as pltpu

N_PAD = 128       # padded width of the final layer -> lane-dense MXU pass & store
TARGET_TB = 512   # target batch-tile rows


def _leaky_relu(x, slope=0.2):
    return jnp.where(x > 0, x, slope * x)


def discriminator_kernel(x_ref, w1_ref, b1_ref, w2_ref, b2_ref, w3_ref, b3_ref,
                         out_ref):
    # x_ref: (TB, F) f32 batch tile. Cast to bf16 in-kernel (fused, hidden
    # under the MXU) instead of a separate wrapper-side HBM pass.
    x = x_ref[...].astype(jnp.bfloat16)

    # Linear(F, 512) + LeakyReLU(0.2)   [bf16 MXU inputs, f32 accumulation]
    h1 = jnp.dot(x, w1_ref[...], preferred_element_type=jnp.float32)
    h1 = _leaky_relu(h1 + b1_ref[...])

    # Linear(512, 256) + LeakyReLU(0.2)
    h2 = jnp.dot(h1.astype(jnp.bfloat16), w2_ref[...],
                 preferred_element_type=jnp.float32)
    h2 = _leaky_relu(h2 + b2_ref[...])

    # Linear(256, 1) + Sigmoid, computed on a 128-wide padded N so the MXU
    # pass and the output store are lane-dense (real logit in column 0).
    h3 = jnp.dot(h2.astype(jnp.bfloat16), w3_ref[...],
                 preferred_element_type=jnp.float32)
    h3 = h3 + b3_ref[...]
    # bf16 store halves the output writeback traffic; wrapper casts back.
    out_ref[...] = jax.nn.sigmoid(h3).astype(out_ref.dtype)


def prepare_params(params_f32):
    """Convert PyTorch-style f32 params (weights already (in,out)) into the
    kernel layout: bf16 weights, f32 biases, last layer padded to 128 wide."""
    w1, b1, w2, b2, w3, b3 = params_f32
    w3p = jnp.zeros((w3.shape[0], N_PAD), jnp.float32).at[:, :1].set(w3)
    b3p = jnp.zeros((1, N_PAD), jnp.float32).at[:, :1].set(b3)
    return (w1.astype(jnp.bfloat16), b1.astype(jnp.float32),
            w2.astype(jnp.bfloat16), b2.astype(jnp.float32),
            w3p.astype(jnp.bfloat16), b3p.astype(jnp.float32))


def _pick_batch_tile(B, target=TARGET_TB):
    """Choose (tb, padded_B).

    * B <= target: one tile covering the whole batch (block == full dim is
      always a legal block shape), no padding.
    * B  > target: >= 2 grid steps (feeds both TensorCores on v7x via the
      'parallel' axis), tile rounded up to a sublane multiple so padding is
      at most a handful of rows.
    """
    if B <= target:
        return B, B
    n_tiles = pl.cdiv(B, target)          # >= 2
    tb = -(-B // n_tiles)                 # ceil(B / n_tiles)
    tb = -(-tb // 8) * 8                  # sublane-align
    return tb, n_tiles * tb


def discriminator_forward(img, kernel_params):
    """img: (B, C, H, W) float32 -> validity: (B, 1) float32."""
    B = img.shape[0]
    F = int(np.prod(img.shape[1:]))
    x = img.reshape(B, F)                 # contiguous view; stays f32 (cast fused in-kernel)

    tb, Bp = _pick_batch_tile(B)
    n_tiles = Bp // tb
    if Bp != B:
        x = jnp.pad(x, ((0, Bp - B), (0, 0)))   # only when unavoidable; few rows

    w1, b1, w2, b2, w3, b3 = kernel_params

    weight_bytes = ((w1.size + w2.size + w3.size) * 2 +
                    (b1.size + b2.size + b3.size) * 4)
    cost = pl.CostEstimate(
        flops=2 * Bp * (F * 512 + 512 * 256 + 256 * N_PAD),
        transcendentals=Bp,                                   # one sigmoid per real row
        bytes_accessed=Bp * F * 4 + weight_bytes + Bp * N_PAD * 2,
    )

    # Whole-array VMEM residents: constant across the grid, single-buffered.
    resident = pl.BlockSpec(memory_space=pltpu.MemorySpace.VMEM)

    out = pl.pallas_call(
        discriminator_kernel,
        out_shape=jax.ShapeDtypeStruct((Bp, N_PAD), jnp.bfloat16),
        grid_spec=pltpu.PrefetchScalarGridSpec(
            num_scalar_prefetch=0,
            grid=(n_tiles,),
            in_specs=[
                pl.BlockSpec((tb, F), lambda i: (i, 0)),      # x tile (pipelined)
                resident,   # w1
                resident,   # b1
                resident,   # w2
                resident,   # b2
                resident,   # w3 (padded to 128 wide)
                resident,   # b3 (padded to 128 wide)
            ],
            out_specs=pl.BlockSpec((tb, N_PAD), lambda i: (i, 0)),
        ),
        compiler_params=pltpu.CompilerParams(
            dimension_semantics=("parallel",),
        ),
        cost_estimate=cost,
    )(x, w1, b1, w2, b2, w3, b3)

    return out[:B, :1].astype(jnp.float32)


def init_params(key, in_features):
    """Deterministic init mimicking PyTorch nn.Linear default
    (uniform(-1/sqrt(fan_in), 1/sqrt(fan_in))). Weights stored as
    (in, out) — already transposed for the kernel's x @ W convention."""
    dims = [(in_features, 512), (512, 256), (256, 1)]
    params = []
    for (fan_in, fan_out) in dims:
        key, kw, kb = jax.random.split(key, 3)
        bound = 1.0 / np.sqrt(fan_in)
        w = jax.random.uniform(kw, (fan_in, fan_out), jnp.float32,
                               minval=-bound, maxval=bound)
        b = jax.random.uniform(kb, (1, fan_out), jnp.float32,
                               minval=-bound, maxval=bound)
        params.extend([w, b])
    return tuple(params)


if __name__ == "__main__":
    # Small, module-consistent shapes: channels=4, img_size=16 -> F = 1024
    B, C, H, W = 2, 4, 16, 16
    key = jax.random.PRNGKey(0)
    k_img, k_par = jax.random.split(key)

    img = jax.random.normal(k_img, (B, C, H, W), dtype=jnp.float32)
    params_f32 = init_params(k_par, C * H * W)
    kernel_params = prepare_params(params_f32)

    validity = discriminator_forward(img, kernel_params)
    validity = jax.block_until_ready(validity)

    # Pure-JAX reference following the same bf16-matmul / f32-accumulate path.
    def ref(img, params):
        w1, b1, w2, b2, w3, b3 = params
        x = img.reshape(img.shape[0], -1).astype(jnp.bfloat16)
        h = jnp.dot(x, w1.astype(jnp.bfloat16),
                    preferred_element_type=jnp.float32) + b1
        h = jnp.where(h > 0, h, 0.2 * h)
        h = jnp.dot(h.astype(jnp.bfloat16), w2.astype(jnp.bfloat16),
                    preferred_element_type=jnp.float32) + b2
        h = jnp.where(h > 0, h, 0.2 * h)
        h = jnp.dot(h.astype(jnp.bfloat16), w3.astype(jnp.bfloat16),
                    preferred_element_type=jnp.float32) + b3
        return jax.nn.sigmoid(h)

    expected = ref(img, params_f32)
    assert validity.shape == (B, 1)
    # Tolerance covers the bf16 rounding of the stored sigmoid output.
    np.testing.assert_allclose(np.asarray(validity), np.asarray(expected),
                               rtol=2e-3, atol=2e-3)
    print("KERNEL_OK")
</pallas_src>

<mosaic_0001>
module attributes {stable_mosaic.version = 11 : i64} {
  func.func @discriminator_kernel(%arg0: i32, %arg1: memref<2x1024xf32, #tpu.memory_space<vmem>>, %arg2: memref<1024x512xbf16, #tpu.memory_space<vmem>>, %arg3: memref<1x512xf32, #tpu.memory_space<vmem>>, %arg4: memref<512x256xbf16, #tpu.memory_space<vmem>>, %arg5: memref<1x256xf32, #tpu.memory_space<vmem>>, %arg6: memref<256x128xbf16, #tpu.memory_space<vmem>>, %arg7: memref<1x128xf32, #tpu.memory_space<vmem>>, %arg8: memref<2x128xbf16, #tpu.memory_space<vmem>>) attributes {dimension_semantics = [#tpu.dimension_semantics<parallel>], iteration_bounds = array<i64: 1>, scalar_prefetch = 0 : i64, scratch_operands = 0 : i64, tpu.core_type = #tpu.core_type<tc>, window_params = [{transform_indices = @transform_0, window_bounds = array<i64: 2, 1024>}, {pipeline_mode = #tpu.pipeline_mode<synchronous>, transform_indices = @transform_1, window_bounds = array<i64: 1024, 512>}, {pipeline_mode = #tpu.pipeline_mode<synchronous>, transform_indices = @transform_2, window_bounds = array<i64: 1, 512>}, {pipeline_mode = #tpu.pipeline_mode<synchronous>, transform_indices = @transform_3, window_bounds = array<i64: 512, 256>}, {pipeline_mode = #tpu.pipeline_mode<synchronous>, transform_indices = @transform_4, window_bounds = array<i64: 1, 256>}, {pipeline_mode = #tpu.pipeline_mode<synchronous>, transform_indices = @transform_5, window_bounds = array<i64: 256, 128>}, {pipeline_mode = #tpu.pipeline_mode<synchronous>, transform_indices = @transform_6, window_bounds = array<i64: 1, 128>}, {transform_indices = @transform_7, window_bounds = array<i64: 2, 128>}]} {
    %c0 = arith.constant 0 : index
    %c0_0 = arith.constant 0 : index
    %0 = vector.load %arg1[%c0, %c0_0] : memref<2x1024xf32, #tpu.memory_space<vmem>>, vector<2x1024xf32>
    %1 = arith.truncf %0 : vector<2x1024xf32> to vector<2x1024xbf16>
    %c0_1 = arith.constant 0 : index
    %c0_2 = arith.constant 0 : index
    %2 = vector.load %arg2[%c0_1, %c0_2] : memref<1024x512xbf16, #tpu.memory_space<vmem>>, vector<1024x512xbf16>
    %cst = arith.constant dense<0.000000e+00> : vector<2x512xf32>
    %3 = tpu.matmul %1, %2, %cst {dimension_numbers = #tpu.dot_dimension_numbers<[1], [0], [0], [1], [0, 0, 1, 1], [], []>} : vector<2x1024xbf16>, vector<1024x512xbf16>, vector<2x512xf32> -> vector<2x512xf32>
    %c0_3 = arith.constant 0 : index
    %c0_4 = arith.constant 0 : index
    %4 = vector.load %arg3[%c0_3, %c0_4] : memref<1x512xf32, #tpu.memory_space<vmem>>, vector<1x512xf32>
    %5 = vector.broadcast %4 : vector<1x512xf32> to vector<2x512xf32>
    %6 = arith.addf %3, %5 : vector<2x512xf32>
    %cst_5 = arith.constant 0.000000e+00 : f32
    %7 = vector.broadcast %cst_5 : f32 to vector<2x512xf32>
    %8 = arith.cmpf ogt, %6, %7 : vector<2x512xf32>
    %cst_6 = arith.constant 2.000000e-01 : f32
    %9 = vector.broadcast %cst_6 : f32 to vector<2x512xf32>
    %10 = arith.mulf %9, %6 : vector<2x512xf32>
    %11 = arith.select %8, %6, %10 : vector<2x512xi1>, vector<2x512xf32>
    %12 = arith.truncf %11 : vector<2x512xf32> to vector<2x512xbf16>
    %c0_7 = arith.constant 0 : index
    %c0_8 = arith.constant 0 : index
    %13 = vector.load %arg4[%c0_7, %c0_8] : memref<512x256xbf16, #tpu.memory_space<vmem>>, vector<512x256xbf16>
    %cst_9 = arith.constant dense<0.000000e+00> : vector<2x256xf32>
    %14 = tpu.matmul %12, %13, %cst_9 {dimension_numbers = #tpu.dot_dimension_numbers<[1], [0], [0], [1], [0, 0, 1, 1], [], []>} : vector<2x512xbf16>, vector<512x256xbf16>, vector<2x256xf32> -> vector<2x256xf32>
    %c0_10 = arith.constant 0 : index
    %c0_11 = arith.constant 0 : index
    %15 = vector.load %arg5[%c0_10, %c0_11] : memref<1x256xf32, #tpu.memory_space<vmem>>, vector<1x256xf32>
    %16 = vector.broadcast %15 : vector<1x256xf32> to vector<2x256xf32>
    %17 = arith.addf %14, %16 : vector<2x256xf32>
    %cst_12 = arith.constant 0.000000e+00 : f32
    %18 = vector.broadcast %cst_12 : f32 to vector<2x256xf32>
    %19 = arith.cmpf ogt, %17, %18 : vector<2x256xf32>
    %cst_13 = arith.constant 2.000000e-01 : f32
    %20 = vector.broadcast %cst_13 : f32 to vector<2x256xf32>
    %21 = arith.mulf %20, %17 : vector<2x256xf32>
    %22 = arith.select %19, %17, %21 : vector<2x256xi1>, vector<2x256xf32>
    %23 = arith.truncf %22 : vector<2x256xf32> to vector<2x256xbf16>
    %c0_14 = arith.constant 0 : index
    %c0_15 = arith.constant 0 : index
    %24 = vector.load %arg6[%c0_14, %c0_15] : memref<256x128xbf16, #tpu.memory_space<vmem>>, vector<256x128xbf16>
    %cst_16 = arith.constant dense<0.000000e+00> : vector<2x128xf32>
    %25 = tpu.matmul %23, %24, %cst_16 {dimension_numbers = #tpu.dot_dimension_numbers<[1], [0], [0], [1], [0, 0, 1, 1], [], []>} : vector<2x256xbf16>, vector<256x128xbf16>, vector<2x128xf32> -> vector<2x128xf32>
    %c0_17 = arith.constant 0 : index
    %c0_18 = arith.constant 0 : index
    %26 = vector.load %arg7[%c0_17, %c0_18] : memref<1x128xf32, #tpu.memory_space<vmem>>, vector<1x128xf32>
    %27 = vector.broadcast %26 : vector<1x128xf32> to vector<2x128xf32>
    %28 = arith.addf %25, %27 : vector<2x128xf32>
    %29 = arith.negf %28 : vector<2x128xf32>
    %30 = math.exp %29 : vector<2x128xf32>
    %cst_19 = arith.constant 1.000000e+00 : f32
    %31 = vector.broadcast %cst_19 : f32 to vector<2x128xf32>
    %32 = arith.addf %31, %30 : vector<2x128xf32>
    %33 = arith.divf %31, %32 : vector<2x128xf32>
    %34 = arith.truncf %33 : vector<2x128xf32> to vector<2x128xbf16>
    %c0_20 = arith.constant 0 : index
    %c0_21 = arith.constant 0 : index
    %35 = vector.load %arg8[%c0_20, %c0_21] : memref<2x128xbf16, #tpu.memory_space<vmem>>, vector<2x128xbf16>
    tpu.vector_store %arg8[%c0_20, %c0_21], %34 {strides = array<i32>} : memref<2x128xbf16, #tpu.memory_space<vmem>>, vector<2x128xbf16>,
    return
  }
  func.func @transform_0(%arg0: i32) -> (i32, i32) {
    %c0_i32 = arith.constant 0 : i32
    %c0_i32_0 = arith.constant 0 : i32
    return %arg0, %c0_i32 : i32, i32
  }
  func.func @transform_1(%arg0: i32) -> (i32, i32) {
    %c0_i32 = arith.constant 0 : i32
    %c0_i32_0 = arith.constant 0 : i32
    %c0_i32_1 = arith.constant 0 : i32
    return %c0_i32, %c0_i32_0 : i32, i32
  }
  func.func @transform_2(%arg0: i32) -> (i32, i32) {
    %c0_i32 = arith.constant 0 : i32
    %c0_i32_0 = arith.constant 0 : i32
    %c0_i32_1 = arith.constant 0 : i32
    return %c0_i32, %c0_i32_0 : i32, i32
  }
  func.func @transform_3(%arg0: i32) -> (i32, i32) {
    %c0_i32 = arith.constant 0 : i32
    %c0_i32_0 = arith.constant 0 : i32
    %c0_i32_1 = arith.constant 0 : i32
    return %c0_i32, %c0_i32_0 : i32, i32
  }
  func.func @transform_4(%arg0: i32) -> (i32, i32) {
    %c0_i32 = arith.constant 0 : i32
    %c0_i32_0 = arith.constant 0 : i32
    %c0_i32_1 = arith.constant 0 : i32
    return %c0_i32, %c0_i32_0 : i32, i32
  }
  func.func @transform_5(%arg0: i32) -> (i32, i32) {
    %c0_i32 = arith.constant 0 : i32
    %c0_i32_0 = arith.constant 0 : i32
    %c0_i32_1 = arith.constant 0 : i32
    return %c0_i32, %c0_i32_0 : i32, i32
  }
  func.func @transform_6(%arg0: i32) -> (i32, i32) {
    %c0_i32 = arith.constant 0 : i32
    %c0_i32_0 = arith.constant 0 : i32
    %c0_i32_1 = arith.constant 0 : i32
    return %c0_i32, %c0_i32_0 : i32, i32
  }
  func.func @transform_7(%arg0: i32) -> (i32, i32) {
    %c0_i32 = arith.constant 0 : i32
    %c0_i32_0 = arith.constant 0 : i32
    return %arg0, %c0_i32 : i32, i32
  }
}

</mosaic_0001>

<bundles_post_ra>
// kernel: tpu_custom_call.1
= control target key start
LH: loop header
LB: loop body
LE: loop exit
PB: predicated region body
PF: predicated region fallthrough
CT: control target
= control target key end

     0   :  { %12 = vsyncpa [#allocation3], 0  ;;  %s4821_s0 = inlined_call_operand.hbm [shape: f32[2,1024], index: 0, kind: input, shape index: {}]   ;;  %s4822_s1 = inlined_call_operand.hbm [shape: bf16[1024,512], index: 1, kind: input, shape index: {}]   ;;  %s4823_s2 = inlined_call_operand.hbm [shape: f32[1,512], index: 2, kind: input, shape index: {}]   ;;  %s4824_s3 = inlined_call_operand.hbm [shape: bf16[512,256], index: 3, kind: input, shape index: {}]   ;;  %s4825_s4 = inlined_call_operand.vmem [shape: f32[1,256], index: 4, kind: input, shape index: {}]   ;;  %s4826_s5 = inlined_call_operand.hbm [shape: bf16[256,128], index: 5, kind: input, shape index: {}]   ;;  %s4827_s6 = inlined_call_operand.vmem [shape: f32[1,128], index: 6, kind: input, shape index: {}]   ;;  %s4828_s7 = inlined_call_operand.hbm [shape: bf16[2,128], index: 7, kind: output, shape index: {}]  }
   0x1   :  { %13 = vsyncpa [#allocation6], 0 }
   0x2   :  { %14 = vsyncpa [#allocation9], 0  ;;  %s31_s26 = sshll.u32 %s4822_s1, 4  ;;  %s32_s26 = int_to_ptr.hbm [resolvable:$true] %s31_s26 }
   0x3   :  { %15 = vsyncpa [#allocation4], 0  ;;  %s4661_s27 = smov [#allocation5]   ;;  %s55_s8 = sshll.u32 %s4824_s3, 4  ;;  %s56_s8 = int_to_ptr.hbm [resolvable:$true] %s55_s8 }
   0x4   :  { %s33_s28 = sshll.u32 %s4661_s27, 4  ;;  %s4662_s9 = smov 256   ;;  %s34_s28 = int_to_ptr.vmem [resolvable:$true] %s33_s28 }
   0x5   :  { %s4663_s10 = smov 16   ;;  %s4664_s11 = smov [#allocation8]  }
   0x6   :  { %39 = dma.hbm_to_vmem [thread:$0]  %s32_s26, 32768, %s34_s28, [#allocation6], %s4662_s9, %s4662_s9, %s4663_s10  }
   0x7   :  { %s57_s12 = sshll.u32 %s4664_s11, 4  ;;  %s4665_s13 = smov 128   ;;  %s58_s12 = int_to_ptr.vmem [resolvable:$true] %s57_s12 }
   0x8   :  { %s4666_s14 = smov 8   ;;  %s21_s16 = sshll.u32 %s4821_s0, 4  ;;  %s22_s16 = int_to_ptr.hbm [resolvable:$true] %s21_s16 }
   0x9   :  { %63 = dma.hbm_to_vmem [thread:$0]  %s56_s8, 8192, %s58_s12, [#allocation9], %s4665_s13, %s4665_s13, %s4666_s14  }
   0xa   :  { %s4667_s17 = smov [#allocation2]   ;;  %s45_s20 = sshll.u32 %s4823_s2, 4  ;;  %s46_s20 = int_to_ptr.hbm [resolvable:$true] %s45_s20 }
   0xb   :  { %s23_s18 = sshll.u32 %s4667_s17, 4  ;;  %s4668_s21 = smov [#allocation7]   ;;  %s24_s18 = int_to_ptr.vmem [resolvable:$true] %s23_s18 }
   0xc   :  { %26 = dma.hbm_to_vmem [thread:$0]  %s22_s16, 256, %s24_s18, [#allocation3]  }
   0xd   :  { %s47_s22 = sshll.u32 %s4668_s21, 4  ;;  %s70_s25 = sshll.u32 %s4826_s5, 4  ;;  %s48_s22 = int_to_ptr.vmem [resolvable:$true] %s47_s22  ;;  %s71_s25 = int_to_ptr.hbm [resolvable:$true] %s70_s25 }
   0xe   :  { %50 = dma.hbm_to_vmem [thread:$0]  %s46_s20, 64, %s48_s22, [#allocation6]  }
   0xf   :  { %s4669_s0 = smov [#allocation10]   ;;  %s4670_s27 = smov 64  }
  0x10   :  { %s72_s26 = sshll.u32 %s4669_s0, 4  ;;  %s4671_s28 = smov 4   ;;  %s73_s26 = int_to_ptr.vmem [resolvable:$true] %s72_s26 }
  0x11   :  { %78 = dma.hbm_to_vmem [thread:$0]  %s71_s25, 2048, %s73_s26, [#allocation9], %s4670_s27, %s4670_s27, %s4671_s28  }
  0x12   :  { %4653 = dma.done.wait [#allocation3], 256  }
  0x13   :  { %4654 = vsyncadd [#allocation3], 4294967040 }
  0x14   :  { %4655 = dma.done.wait [#allocation6], 32832  }
  0x15   :  { %4656 = vsyncadd [#allocation6], 4294934464 }
  0x16   :  { %4657 = dma.done.wait [#allocation9], 10240  }
  0x17   :  { %4658 = vsyncadd [#allocation9], 4294957056  ;;  %v2924_v0 = vld [vmem:[#allocation5 + $0xe0] sm:$0xf]  ;;  %v4185_v1 = vld [vmem:[#allocation5 + $0xec] sm:$0xf0] }
  0x18   :  { %v3052_v2 = vld [vmem:[#allocation5 + $0x1e0] sm:$0xf]  ;;  %v2925_v3 = vor.u32 %v4185_v1, %v2924_v0  ;;  %v4217_v4 = vld [vmem:[#allocation5 + $0x1ec] sm:$0xf0]  ;;  %s2798_s10 = sshll.u32 %s4828_s7, 4  ;;  %s2799_s10 = int_to_ptr.hbm [resolvable:$true] %s2798_s10 }
  0x19   :  { %v3180_v5 = vld [vmem:[#allocation5 + $0x2e0] sm:$0xf]  ;;  %v4249_v6 = vld [vmem:[#allocation5 + $0x2ec] sm:$0xf0]  ;;  %v3053_v7 = vor.u32 %v4217_v4, %v3052_v2 }
  0x1a   :  { %v3181_v8 = vor.u32 %v4249_v6, %v3180_v5  ;;  %v3308_v9 = vld [vmem:[#allocation5 + $0x3e0] sm:$0xf]  ;;  %v4281_v10 = vld [vmem:[#allocation5 + $0x3ec] sm:$0xf0]  ;;  %1678 = vmatpush.bf16.msra.mxu0 %v2925_v3 }
  0x1b   :  { %v2908_v11 = vld [vmem:[#allocation5 + $0xc0] sm:$0xf]  ;;  %v3309_v12 = vor.u32 %v4281_v10, %v3308_v9  ;;  %v4181_v13 = vld [vmem:[#allocation5 + $0xcc] sm:$0xf0]  ;;  %1691 = vmatpush.bf16.msra.mxu1 %v3053_v7 }
  0x1c   :  { %v3036_v14 = vld [vmem:[#allocation5 + $0x1c0] sm:$0xf]  ;;  %v4213_v15 = vld [vmem:[#allocation5 + $0x1cc] sm:$0xf0]  ;;  %1704 = vmatpush.bf16.msra.mxu2 %v3181_v8  ;;  %v2909_v16 = vor.u32 %v4181_v13, %v2908_v11 }
  0x1d   :  { %v3037_v17 = vor.u32 %v4213_v15, %v3036_v14  ;;  %v3164_v18 = vld [vmem:[#allocation5 + $0x2c0] sm:$0xf]  ;;  %v4245_v19 = vld [vmem:[#allocation5 + $0x2cc] sm:$0xf0]  ;;  %1717 = vmatpush.bf16.msra.mxu3 %v3309_v12 }
  0x1e   :  { %v3292_v20 = vld [vmem:[#allocation5 + $0x3c0] sm:$0xf]  ;;  %v3165_v21 = vor.u32 %v4245_v19, %v3164_v18  ;;  %v4277_v22 = vld [vmem:[#allocation5 + $0x3cc] sm:$0xf0]  ;;  %1679 = vmatpush.bf16.msra.mxu0 %v2909_v16 }
  0x1f   :  { %v2892_v23 = vld [vmem:[#allocation5 + $0xa0] sm:$0xf]  ;;  %v4177_v24 = vld [vmem:[#allocation5 + $0xac] sm:$0xf0]  ;;  %v3293_v25 = vor.u32 %v4277_v22, %v3292_v20  ;;  %1692 = vmatpush.bf16.msra.mxu1 %v3037_v17 }
  0x20   :  { %v3020_v26 = vld [vmem:[#allocation5 + $0x1a0] sm:$0xf]  ;;  %v4209_v27 = vld [vmem:[#allocation5 + $0x1ac] sm:$0xf0]  ;;  %v2893_v29 = vor.u32 %v4177_v24, %v2892_v23  ;;  %1705 = vmatpush.bf16.msra.mxu2 %v3165_v21 }
  0x21   :  { %v3148_v28 = vld [vmem:[#allocation5 + $0x2a0] sm:$0xf]  ;;  %v4241_v30 = vld [vmem:[#allocation5 + $0x2ac] sm:$0xf0]  ;;  %v3021_v33 = vor.u32 %v4209_v27, %v3020_v26  ;;  %1718 = vmatpush.bf16.msra.mxu3 %v3293_v25 }
  0x22   :  { %v3276_v31 = vld [vmem:[#allocation5 + $0x3a0] sm:$0xf]  ;;  %v4273_v32 = vld [vmem:[#allocation5 + $0x3ac] sm:$0xf0]  ;;  %v3149_v34 = vor.u32 %v4241_v30, %v3148_v28  ;;  %1680 = vmatpush.bf16.msra.mxu0 %v2893_v29 }
  0x23   :  { %v2876_v35 = vld [vmem:[#allocation5 + $0x80] sm:$0xf]  ;;  %v4173_v36 = vld [vmem:[#allocation5 + $0x8c] sm:$0xf0]  ;;  %v3277_v38 = vor.u32 %v4273_v32, %v3276_v31  ;;  %1693 = vmatpush.bf16.msra.mxu1 %v3021_v33 }
  0x24   :  { %v3004_v37 = vld [vmem:[#allocation5 + $0x180] sm:$0xf]  ;;  %v4205_v39 = vld [vmem:[#allocation5 + $0x18c] sm:$0xf0]  ;;  %v2877_v44 = vor.u32 %v4173_v36, %v2876_v35  ;;  %1706 = vmatpush.bf16.msra.mxu2 %v3149_v34 }
  0x25   :  { %v3132_v40 = vld [vmem:[#allocation5 + $0x280] sm:$0xf]  ;;  %v4237_v41 = vld [vmem:[#allocation5 + $0x28c] sm:$0xf0]  ;;  %v3005_v45 = vor.u32 %v4205_v39, %v3004_v37  ;;  %1719 = vmatpush.bf16.msra.mxu3 %v3277_v38 }
  0x26   :  { %v3260_v42 = vld [vmem:[#allocation5 + $0x380] sm:$0xf]  ;;  %v4269_v43 = vld [vmem:[#allocation5 + $0x38c] sm:$0xf0]  ;;  %v3133_v46 = vor.u32 %v4237_v41, %v3132_v40  ;;  %1681 = vmatpush.bf16.msra.mxu0 %v2877_v44 }
  0x27   :  { %v2860_v47 = vld [vmem:[#allocation5 + $0x60] sm:$0xf]  ;;  %v4169_v48 = vld [vmem:[#allocation5 + $0x6c] sm:$0xf0]  ;;  %v3261_v50 = vor.u32 %v4269_v43, %v3260_v42  ;;  %1694 = vmatpush.bf16.msra.mxu1 %v3005_v45 }
  0x28   :  { %v2988_v49 = vld [vmem:[#allocation5 + $0x160] sm:$0xf]  ;;  %v4201_v51 = vld [vmem:[#allocation5 + $0x16c] sm:$0xf0]  ;;  %v2861_v56 = vor.u32 %v4169_v48, %v2860_v47  ;;  %1707 = vmatpush.bf16.msra.mxu2 %v3133_v46 }
  0x29   :  { %v3116_v52 = vld [vmem:[#allocation5 + $0x260] sm:$0xf]  ;;  %v4233_v53 = vld [vmem:[#allocation5 + $0x26c] sm:$0xf0]  ;;  %v2989_v57 = vor.u32 %v4201_v51, %v2988_v49  ;;  %1720 = vmatpush.bf16.msra.mxu3 %v3261_v50 }
  0x2a   :  { %v3244_v54 = vld [vmem:[#allocation5 + $0x360] sm:$0xf]  ;;  %v4265_v55 = vld [vmem:[#allocation5 + $0x36c] sm:$0xf0]  ;;  %v3117_v58 = vor.u32 %v4233_v53, %v3116_v52  ;;  %1682 = vmatpush.bf16.msra.mxu0 %v2861_v56 }
  0x2b   :  { %v2844_v59 = vld [vmem:[#allocation5 + $0x40] sm:$0xf]  ;;  %v4165_v60 = vld [vmem:[#allocation5 + $0x4c] sm:$0xf0]  ;;  %v3245_v62 = vor.u32 %v4265_v55, %v3244_v54  ;;  %1695 = vmatpush.bf16.msra.mxu1 %v2989_v57 }
  0x2c   :  { %v2972_v61 = vld [vmem:[#allocation5 + $0x140] sm:$0xf]  ;;  %v4197_v63 = vld [vmem:[#allocation5 + $0x14c] sm:$0xf0]  ;;  %v2845_v4 = vor.u32 %v4165_v60, %v2844_v59  ;;  %1708 = vmatpush.bf16.msra.mxu2 %v3117_v58 }
  0x2d   :  { %v3100_v0 = vld [vmem:[#allocation5 + $0x240] sm:$0xf]  ;;  %v4229_v1 = vld [vmem:[#allocation5 + $0x24c] sm:$0xf0]  ;;  %v2973_v5 = vor.u32 %v4197_v63, %v2972_v61  ;;  %1721 = vmatpush.bf16.msra.mxu3 %v3245_v62 }
  0x2e   :  { %v3228_v2 = vld [vmem:[#allocation5 + $0x340] sm:$0xf]  ;;  %v4261_v3 = vld [vmem:[#allocation5 + $0x34c] sm:$0xf0]  ;;  %v3101_v6 = vor.u32 %v4229_v1, %v3100_v0  ;;  %1683 = vmatpush.bf16.msra.mxu0 %v2845_v4 }
  0x2f   :  { %v2828_v7 = vld [vmem:[#allocation5 + $0x20] sm:$0xf]  ;;  %v4161_v8 = vld [vmem:[#allocation5 + $0x2c] sm:$0xf0]  ;;  %v3229_v10 = vor.u32 %v4261_v3, %v3228_v2  ;;  %1696 = vmatpush.bf16.msra.mxu1 %v2973_v5 }
  0x30   :  { %v2956_v9 = vld [vmem:[#allocation5 + $0x120] sm:$0xf]  ;;  %v4193_v11 = vld [vmem:[#allocation5 + $0x12c] sm:$0xf0]  ;;  %v2829_v16 = vor.u32 %v4161_v8, %v2828_v7  ;;  %1709 = vmatpush.bf16.msra.mxu2 %v3101_v6 }
  0x31   :  { %v3084_v12 = vld [vmem:[#allocation5 + $0x220] sm:$0xf]  ;;  %v4225_v13 = vld [vmem:[#allocation5 + $0x22c] sm:$0xf0]  ;;  %v2957_v19 = vor.u32 %v4193_v11, %v2956_v9  ;;  %1722 = vmatpush.bf16.msra.mxu3 %v3229_v10 }
  0x32   :  { %v3212_v14 = vld [vmem:[#allocation5 + $0x320] sm:$0xf]  ;;  %v4257_v15 = vld [vmem:[#allocation5 + $0x32c] sm:$0xf0]  ;;  %v3085_v20 = vor.u32 %v4225_v13, %v3084_v12  ;;  %1684 = vmatpush.bf16.msra.mxu0 %v2829_v16 }
  0x33   :  { %v2812_v17 = vld [vmem:[#allocation5] sm:$0xf]  ;;  %v4157_v18 = vld [vmem:[#allocation5 + $0xc] sm:$0xf0]  ;;  %v3213_v24 = vor.u32 %v4257_v15, %v3212_v14  ;;  %1697 = vmatpush.bf16.msra.mxu1 %v2957_v19 }
  0x34   :  { %v2940_v21 = vld [vmem:[#allocation5 + $0x100] sm:$0xf]  ;;  %v4189_v22 = vld [vmem:[#allocation5 + $0x10c] sm:$0xf0]  ;;  %v2813_v31 = vor.u32 %v4157_v18, %v2812_v17  ;;  %1710 = vmatpush.bf16.msra.mxu2 %v3085_v20 }
  0x35   :  { %v3068_v23 = vld [vmem:[#allocation5 + $0x200] sm:$0xf]  ;;  %v4221_v25 = vld [vmem:[#allocation5 + $0x20c] sm:$0xf0]  ;;  %v2941_v35 = vor.u32 %v4189_v22, %v2940_v21  ;;  %1723 = vmatpush.bf16.msra.mxu3 %v3213_v24 }
  0x36   :  { %v3196_v26 = vld [vmem:[#allocation5 + $0x300] sm:$0xf]  ;;  %v4253_v27 = vld [vmem:[#allocation5 + $0x30c] sm:$0xf0]  ;;  %v3069_v36 = vor.u32 %v4221_v25, %v3068_v23  ;;  %1685 = vmatpush.bf16.msra.mxu0 %v2813_v31 }
  0x37   :  { %v3436_v28 = vld [vmem:[#allocation5 + $0x4e0] sm:$0xf]  ;;  %v4313_v29 = vld [vmem:[#allocation5 + $0x4ec] sm:$0xf0]  ;;  %v3197_v39 = vor.u32 %v4253_v27, %v3196_v26  ;;  %1698 = vmatpush.bf16.msra.mxu1 %v2941_v35 }
  0x38   :  { %v3564_v30 = vld [vmem:[#allocation5 + $0x5e0] sm:$0xf]  ;;  %v4345_v32 = vld [vmem:[#allocation5 + $0x5ec] sm:$0xf0]  ;;  %v3437_v40 = vor.u32 %v4313_v29, %v3436_v28  ;;  %1711 = vmatpush.bf16.msra.mxu2 %v3069_v36 }
  0x39   :  { %v3692_v33 = vld [vmem:[#allocation5 + $0x6e0] sm:$0xf]  ;;  %v4377_v34 = vld [vmem:[#allocation5 + $0x6ec] sm:$0xf0]  ;;  %v3565_v41 = vor.u32 %v4345_v32, %v3564_v30  ;;  %1724 = vmatpush.bf16.msra.mxu3 %v3197_v39 }
  0x3a   :  { %v3820_v37 = vld [vmem:[#allocation5 + $0x7e0] sm:$0xf]  ;;  %v4409_v38 = vld [vmem:[#allocation5 + $0x7ec] sm:$0xf0]  ;;  %v3693_v42 = vor.u32 %v4377_v34, %v3692_v33  ;;  %1730 = vmatpush.bf16.msrb.mxu0 %v3437_v40 }
  0x3b   :  { %v3420_v43 = vld [vmem:[#allocation5 + $0x4c0] sm:$0xf]  ;;  %v4309_v44 = vld [vmem:[#allocation5 + $0x4cc] sm:$0xf0]  ;;  %v3821_v46 = vor.u32 %v4409_v38, %v3820_v37  ;;  %1743 = vmatpush.bf16.msrb.mxu1 %v3565_v41 }
  0x3c   :  { %v3548_v45 = vld [vmem:[#allocation5 + $0x5c0] sm:$0xf]  ;;  %v4341_v47 = vld [vmem:[#allocation5 + $0x5cc] sm:$0xf0]  ;;  %v3421_v52 = vor.u32 %v4309_v44, %v3420_v43  ;;  %1756 = vmatpush.bf16.msrb.mxu2 %v3693_v42 }
  0x3d   :  { %v3676_v48 = vld [vmem:[#allocation5 + $0x6c0] sm:$0xf]  ;;  %v4373_v49 = vld [vmem:[#allocation5 + $0x6cc] sm:$0xf0]  ;;  %v3549_v55 = vor.u32 %v4341_v47, %v3548_v45  ;;  %1769 = vmatpush.bf16.msrb.mxu3 %v3821_v46 }
  0x3e   :  { %v3804_v50 = vld [vmem:[#allocation5 + $0x7c0] sm:$0xf]  ;;  %v4405_v51 = vld [vmem:[#allocation5 + $0x7cc] sm:$0xf0]  ;;  %v3677_v56 = vor.u32 %v4373_v49, %v3676_v48  ;;  %1731 = vmatpush.bf16.msrb.mxu0 %v3421_v52  ;;  %v102_v52 = vld [vmem:[#allocation2 + $0x8] sm:$0xff] }
  0x3f   :  { %v3404_v53 = vld [vmem:[#allocation5 + $0x4a0] sm:$0xf]  ;;  %v4305_v54 = vld [vmem:[#allocation5 + $0x4ac] sm:$0xf0]  ;;  %v3805_v60 = vor.u32 %v4405_v51, %v3804_v50  ;;  %1744 = vmatpush.bf16.msrb.mxu1 %v3549_v55  ;;  %107 = vst [vmem:[#allocation1 + $0x20] ss:$4 sm:$0xff] %v102_v52 }
  0x40   :  { %v3532_v57 = vld [vmem:[#allocation5 + $0x5a0] sm:$0xf]  ;;  %v4337_v58 = vld [vmem:[#allocation5 + $0x5ac] sm:$0xf0]  ;;  %v3405_v1 = vor.u32 %v4305_v54, %v3404_v53  ;;  %1757 = vmatpush.bf16.msrb.mxu2 %v3677_v56  ;;  %v4271_v52 = vld [vmem:[#allocation5 + $0x3a4] sm:$0xf] }
  0x41   :  { %v101_v59 = vld [vmem:[#allocation2] sm:$0xff]  ;;  %v3660_v61 = vld [vmem:[#allocation5 + $0x6a0] sm:$0xf]  ;;  %v3533_v3 = vor.u32 %v4337_v58, %v3532_v57  ;;  %1770 = vmatpush.bf16.msrb.mxu3 %v3805_v60 }
  0x42   :  { %v4369_v62 = vld [vmem:[#allocation5 + $0x6ac] sm:$0xf0]  ;;  %105 = vst [vmem:[#allocation1] ss:$4 sm:$0xff] %v101_v59  ;;  %v3788_v63 = vld [vmem:[#allocation5 + $0x7a0] sm:$0xf]  ;;  %1732 = vmatpush.bf16.msrb.mxu0 %v3405_v1 }
  0x43   :  { %v4401_v0 = vld [vmem:[#allocation5 + $0x7ac] sm:$0xf0]  ;;  %v3388_v2 = vld [vmem:[#allocation5 + $0x480] sm:$0xf]  ;;  %v3661_v4 = vor.u32 %v4369_v62, %v3660_v61  ;;  %1745 = vmatpush.bf16.msrb.mxu1 %v3533_v3 }
  0x44   :  { %v4301_v5 = vld [vmem:[#allocation5 + $0x48c] sm:$0xf0]  ;;  %v3516_v6 = vld [vmem:[#allocation5 + $0x580] sm:$0xf]  ;;  %v3789_v8 = vor.u32 %v4401_v0, %v3788_v63 }
  0x45   :  { %v4333_v7 = vld [vmem:[#allocation5 + $0x58c] sm:$0xf0]  ;;  %v3644_v9 = vld [vmem:[#allocation5 + $0x680] sm:$0xf]  ;;  %v3389_v15 = vor.u32 %v4301_v5, %v3388_v2  ;;  %1758 = vmatpush.bf16.msrb.mxu2 %v3661_v4 }
  0x46   :  { %v4365_v10 = vld [vmem:[#allocation5 + $0x68c] sm:$0xf0]  ;;  %v3772_v11 = vld [vmem:[#allocation5 + $0x780] sm:$0xf]  ;;  %v3517_v20 = vor.u32 %v4333_v7, %v3516_v6  ;;  %1771 = vmatpush.bf16.msrb.mxu3 %v3789_v8  ;;  %v4183_v6 = vld [vmem:[#allocation5 + $0xe4] sm:$0xf] }
  0x47   :  { %v4397_v12 = vld [vmem:[#allocation5 + $0x78c] sm:$0xf0]  ;;  %v3372_v13 = vld [vmem:[#allocation5 + $0x460] sm:$0xf]  ;;  %v3645_v21 = vor.u32 %v4365_v10, %v3644_v9  ;;  %1733 = vmatpush.bf16.msrb.mxu0 %v3389_v15  ;;  %v2926_v7 = vld [vmem:[#allocation5 + $0xf0] sm:$0xf0] }
  0x48   :  { %v4297_v14 = vld [vmem:[#allocation5 + $0x46c] sm:$0xf0]  ;;  %v3500_v16 = vld [vmem:[#allocation5 + $0x560] sm:$0xf]  ;;  %v3773_v24 = vor.u32 %v4397_v12, %v3772_v11  ;;  %1746 = vmatpush.bf16.msrb.mxu1 %v3517_v20  ;;  %v4215_v8 = vld [vmem:[#allocation5 + $0x1e4] sm:$0xf] }
  0x49   :  { %v4329_v17 = vld [vmem:[#allocation5 + $0x56c] sm:$0xf0]  ;;  %v3628_v18 = vld [vmem:[#allocation5 + $0x660] sm:$0xf]  ;;  %v3373_v33 = vor.u32 %v4297_v14, %v3372_v13  ;;  %1759 = vmatpush.bf16.msrb.mxu2 %v3645_v21  ;;  %v3054_v9 = vld [vmem:[#allocation5 + $0x1f0] sm:$0xf0]  ;;  %v2929_v21 = vor.u32 %v4183_v6, %v2926_v7 }
  0x4a   :  { %v4361_v19 = vld [vmem:[#allocation5 + $0x66c] sm:$0xf0]  ;;  %v110_v22 = vld.sshfl [vmem:[#allocation1 + $0x10] sm:$0xff pattern:$0x73625140]  ;;  %v3501_v34 = vor.u32 %v4329_v17, %v3500_v16  ;;  %1772 = vmatpush.bf16.msrb.mxu3 %v3773_v24  ;;  %v3057_v24 = vor.u32 %v4215_v8, %v3054_v9 }
  0x4b   :  { %v108_v23 = vld.sshfl [vmem:[#allocation1] sm:$0xff pattern:$0x73625140]  ;;  %v4728_v25 = vpack.c.bf16 %v110_v22, %v110_v22  ;;  %v111_v27 = vld.sshfl [vmem:[#allocation1 + $0x18] sm:$0xff pattern:$0x73625140]  ;;  %v3629_v35 = vor.u32 %v4361_v19, %v3628_v18  ;;  %1734 = vmatpush.bf16.msrb.mxu0 %v3373_v33 }
  0x4c   :  { %v4730_v26 = vpack.c.bf16 %v108_v23, %v108_v23  ;;  %v109_v28 = vld.sshfl [vmem:[#allocation1 + $0x8] sm:$0xff pattern:$0x73625140]  ;;  %v3756_v29 = vld [vmem:[#allocation5 + $0x760] sm:$0xf]  ;;  %v4732_v31 = vpack.c.bf16 %v111_v27, %v111_v27  ;;  %1747 = vmatpush.bf16.msrb.mxu1 %v3501_v34 }
  0x4d   :  { %v4393_v30 = vld [vmem:[#allocation5 + $0x76c] sm:$0xf0]  ;;  %v4734_v32 = vpack.c.bf16 %v109_v28, %v109_v28  ;;  %1712 = vmatmul.bf16.vlgmr.msra.gmra.mxu2 %v4728_v25  ;;  %v3356_v36 = vld [vmem:[#allocation5 + $0x440] sm:$0xf]  ;;  %v4247_v10 = vld [vmem:[#allocation5 + $0x2e4] sm:$0xf] }
  0x4e   :  { %v4293_v37 = vld [vmem:[#allocation5 + $0x44c] sm:$0xf0]  ;;  %v3484_v38 = vld [vmem:[#allocation5 + $0x540] sm:$0xf]  ;;  %v3757_v39 = vor.u32 %v4393_v30, %v3756_v29  ;;  %1686 = vmatmul.bf16.vlgmr.msra.gmra.mxu0 %v4730_v26  ;;  %1725 = vmatmul.bf16.vlgmr.msra.gmra.mxu3 %v4732_v31  ;;  %v3182_v12 = vld [vmem:[#allocation5 + $0x2f0] sm:$0xf0] }
  0x4f   :  { %v4325_v40 = vld [vmem:[#allocation5 + $0x54c] sm:$0xf0]  ;;  %v3612_v41 = vld [vmem:[#allocation5 + $0x640] sm:$0xf]  ;;  %1699 = vmatmul.bf16.vlgmr.msra.gmra.mxu1 %v4734_v32  ;;  %v3357_v45 = vor.u32 %v4293_v37, %v3356_v36  ;;  %1760 = vmatpush.bf16.msrb.mxu2 %v3629_v35  ;;  %v4279_v13 = vld [vmem:[#allocation5 + $0x3e4] sm:$0xf]  ;;  %v3185_v27 = vor.u32 %v4247_v10, %v3182_v12 }
  0x50   :  { %v4357_v42 = vld [vmem:[#allocation5 + $0x64c] sm:$0xf0]  ;;  %v3740_v43 = vld [vmem:[#allocation5 + $0x740] sm:$0xf]  ;;  %v3485_v48 = vor.u32 %v4325_v40, %v3484_v38  ;;  %1773 = vmatpush.bf16.msrb.mxu3 %v3757_v39  ;;  %v3310_v14 = vld [vmem:[#allocation5 + $0x3f0] sm:$0xf0] }
  0x51   :  { %v4389_v44 = vld [vmem:[#allocation5 + $0x74c] sm:$0xf0]  ;;  %v3340_v46 = vld [vmem:[#allocation5 + $0x420] sm:$0xf]  ;;  %v3613_v49 = vor.u32 %v4357_v42, %v3612_v41  ;;  %1735 = vmatpush.bf16.msrb.mxu0 %v3357_v45  ;;  %v4179_v17 = vld [vmem:[#allocation5 + $0xc4] sm:$0xf]  ;;  %v3313_v30 = vor.u32 %v4279_v13, %v3310_v14 }
  0x52   :  { %v4289_v47 = vld [vmem:[#allocation5 + $0x42c] sm:$0xf0]  ;;  %v3468_v50 = vld [vmem:[#allocation5 + $0x520] sm:$0xf]  ;;  %v3741_v53 = vor.u32 %v4389_v44, %v3740_v43  ;;  %1748 = vmatpush.bf16.msrb.mxu1 %v3485_v48  ;;  %v2910_v18 = vld [vmem:[#allocation5 + $0xd0] sm:$0xf0] }
  0x53   :  { %v4321_v51 = vld [vmem:[#allocation5 + $0x52c] sm:$0xf0]  ;;  %v3596_v54 = vld [vmem:[#allocation5 + $0x620] sm:$0xf]  ;;  %v3341_v59 = vor.u32 %v4289_v47, %v3340_v46  ;;  %1761 = vmatpush.bf16.msrb.mxu2 %v3613_v49  ;;  %v4211_v28 = vld [vmem:[#allocation5 + $0x1c4] sm:$0xf]  ;;  %v2913_v41 = vor.u32 %v4179_v17, %v2910_v18 }
  0x54   :  { %v4353_v55 = vld [vmem:[#allocation5 + $0x62c] sm:$0xf0]  ;;  %v3724_v56 = vld [vmem:[#allocation5 + $0x720] sm:$0xf]  ;;  %v3469_v63 = vor.u32 %v4321_v51, %v3468_v50  ;;  %1774 = vmatpush.bf16.msrb.mxu3 %v3741_v53  ;;  %v3038_v33 = vld [vmem:[#allocation5 + $0x1d0] sm:$0xf0] }
  0x55   :  { %v4385_v57 = vld [vmem:[#allocation5 + $0x72c] sm:$0xf0]  ;;  %v3324_v58 = vld [vmem:[#allocation5 + $0x400] sm:$0xf]  ;;  %v3597_v0 = vor.u32 %v4353_v55, %v3596_v54  ;;  %1736 = vmatpush.bf16.msrb.mxu0 %v3341_v59  ;;  %v4243_v34 = vld [vmem:[#allocation5 + $0x2c4] sm:$0xf]  ;;  %v3041_v43 = vor.u32 %v4211_v28, %v3038_v33 }
  0x56   :  { %v4285_v60 = vld [vmem:[#allocation5 + $0x40c] sm:$0xf0]  ;;  %v3452_v61 = vld [vmem:[#allocation5 + $0x500] sm:$0xf]  ;;  %v3725_v4 = vor.u32 %v4385_v57, %v3724_v56  ;;  %1749 = vmatpush.bf16.msrb.mxu1 %v3469_v63  ;;  %v3166_v35 = vld [vmem:[#allocation5 + $0x2d0] sm:$0xf0] }
  0x57   :  { %v4317_v62 = vld [vmem:[#allocation5 + $0x50c] sm:$0xf0]  ;;  %v3580_v1 = vld [vmem:[#allocation5 + $0x600] sm:$0xf]  ;;  %v3325_v11 = vor.u32 %v4285_v60, %v3324_v58  ;;  %1762 = vmatpush.bf16.msrb.mxu2 %v3597_v0  ;;  %v4275_v37 = vld [vmem:[#allocation5 + $0x3c4] sm:$0xf]  ;;  %v3169_v44 = vor.u32 %v4243_v34, %v3166_v35 }
  0x58   :  { %v4349_v2 = vld [vmem:[#allocation5 + $0x60c] sm:$0xf0]  ;;  %v3708_v3 = vld [vmem:[#allocation5 + $0x700] sm:$0xf]  ;;  %v3453_v15 = vor.u32 %v4317_v62, %v3452_v61  ;;  %1775 = vmatpush.bf16.msrb.mxu3 %v3725_v4  ;;  %v3294_v38 = vld [vmem:[#allocation5 + $0x3d0] sm:$0xf0] }
  0x59   :  { %v4381_v5 = vld [vmem:[#allocation5 + $0x70c] sm:$0xf0]  ;;  %v3581_v16 = vor.u32 %v4349_v2, %v3580_v1  ;;  %v114_v19 = vld.sshfl [vmem:[#allocation1 + $0x30] sm:$0xff pattern:$0x73625140]  ;;  %1737 = vmatpush.bf16.msrb.mxu0 %v3325_v11  ;;  %v3297_v48 = vor.u32 %v4275_v37, %v3294_v38 }
  0x5a   :  { %v3709_v20 = vor.u32 %v4381_v5, %v3708_v3  ;;  %v112_v22 = vld.sshfl [vmem:[#allocation1 + $0x20] sm:$0xff pattern:$0x73625140]  ;;  %v115_v23 = vld.sshfl [vmem:[#allocation1 + $0x38] sm:$0xff pattern:$0x73625140]  ;;  %v4740_v36 = vpack.c.bf16 %v114_v19, %v114_v19  ;;  %1750 = vmatpush.bf16.msrb.mxu1 %v3453_v15 }
  0x5b   :  { %v113_v29 = vld.sshfl [vmem:[#allocation1 + $0x28] sm:$0xff pattern:$0x73625140]  ;;  %1763 = vmatpush.bf16.msrb.mxu2 %v3581_v16  ;;  %v4742_v39 = vpack.c.bf16 %v112_v22, %v112_v22  ;;  %v4744_v40 = vpack.c.bf16 %v115_v23, %v115_v23  ;;  %v4175_v45 = vld [vmem:[#allocation5 + $0xa4] sm:$0xf] }
  0x5c   :  { %1776 = vmatpush.bf16.msrb.mxu3 %v3709_v20  ;;  %v4746_v42 = vpack.c.bf16 %v113_v29, %v113_v29  ;;  %v2894_v46 = vld [vmem:[#allocation5 + $0xb0] sm:$0xf0]  ;;  %v4207_v47 = vld [vmem:[#allocation5 + $0x1a4] sm:$0xf] }
  0x5d   :  { %1782 = vmatpush.bf16.msra.mxu0 %v2929_v21  ;;  %v3022_v49 = vld [vmem:[#allocation5 + $0x1b0] sm:$0xf0]  ;;  %v4239_v50 = vld [vmem:[#allocation5 + $0x2a4] sm:$0xf]  ;;  %v2897_v54 = vor.u32 %v4175_v45, %v2894_v46 }
  0x5e   :  { %1795 = vmatpush.bf16.msra.mxu1 %v3057_v24  ;;  %1764 = vmatmul.bf16.vlgmr.msrb.gmra.mxu2 %v4740_v36  ;;  %v3150_v51 = vld [vmem:[#allocation5 + $0x2b0] sm:$0xf0]  ;;  %v3025_v55 = vor.u32 %v4207_v47, %v3022_v49  ;;  %v4171_v57 = vld [vmem:[#allocation5 + $0x84] sm:$0xf] }
  0x5f   :  { %1808 = vmatpush.bf16.msra.mxu2 %v3185_v27  ;;  %1738 = vmatmul.bf16.vlgmr.msrb.gmra.mxu0 %v4742_v39  ;;  %v3278_v53 = vld [vmem:[#allocation5 + $0x3b0] sm:$0xf0]  ;;  %v3153_v56 = vor.u32 %v4239_v50, %v3150_v51  ;;  %v4203_v59 = vld [vmem:[#allocation5 + $0x184] sm:$0xf] }
  0x60   :  { %1821 = vmatpush.bf16.msra.mxu3 %v3313_v30  ;;  %1751 = vmatmul.bf16.vlgmr.msrb.gmra.mxu1 %v4746_v42  ;;  %v2878_v58 = vld [vmem:[#allocation5 + $0x90] sm:$0xf0]  ;;  %v3281_v60 = vor.u32 %v4271_v52, %v3278_v53  ;;  %v4235_v62 = vld [vmem:[#allocation5 + $0x284] sm:$0xf] }
  0x61   :  { %1777 = vmatmul.bf16.vlgmr.msrb.gmra.mxu3 %v4744_v40  ;;  %1783 = vmatpush.bf16.msra.mxu0 %v2913_v41  ;;  %v3006_v61 = vld [vmem:[#allocation5 + $0x190] sm:$0xf0]  ;;  %v4267_v0 = vld [vmem:[#allocation5 + $0x384] sm:$0xf]  ;;  %v2881_v2 = vor.u32 %v4171_v57, %v2878_v58 }
  0x62   :  { %1796 = vmatpush.bf16.msra.mxu1 %v3041_v43  ;;  %v3134_v63 = vld [vmem:[#allocation5 + $0x290] sm:$0xf0]  ;;  %v3009_v3 = vor.u32 %v4203_v59, %v3006_v61  ;;  %v4167_v5 = vld [vmem:[#allocation5 + $0x64] sm:$0xf] }
  0x63   :  { %1809 = vmatpush.bf16.msra.mxu2 %v3169_v44  ;;  %v3262_v1 = vld [vmem:[#allocation5 + $0x390] sm:$0xf0]  ;;  %v3137_v4 = vor.u32 %v4235_v62, %v3134_v63  ;;  %v4199_v7 = vld [vmem:[#allocation5 + $0x164] sm:$0xf] }
  0x64   :  { %1822 = vmatpush.bf16.msra.mxu3 %v3297_v48  ;;  %v2862_v6 = vld [vmem:[#allocation5 + $0x70] sm:$0xf0]  ;;  %v3265_v8 = vor.u32 %v4267_v0, %v3262_v1  ;;  %v4231_v10 = vld [vmem:[#allocation5 + $0x264] sm:$0xf] }
  0x65   :  { %1784 = vmatpush.bf16.msra.mxu0 %v2897_v54  ;;  %v2990_v9 = vld [vmem:[#allocation5 + $0x170] sm:$0xf0]  ;;  %v4263_v12 = vld [vmem:[#allocation5 + $0x364] sm:$0xf]  ;;  %v2865_v14 = vor.u32 %v4167_v5, %v2862_v6 }
  0x66   :  { %1797 = vmatpush.bf16.msra.mxu1 %v3025_v55  ;;  %v3118_v11 = vld [vmem:[#allocation5 + $0x270] sm:$0xf0]  ;;  %v2993_v15 = vor.u32 %v4199_v7, %v2990_v9  ;;  %v4163_v17 = vld [vmem:[#allocation5 + $0x44] sm:$0xf] }
  0x67   :  { %1810 = vmatpush.bf16.msra.mxu2 %v3153_v56  ;;  %v3246_v13 = vld [vmem:[#allocation5 + $0x370] sm:$0xf0]  ;;  %v3121_v16 = vor.u32 %v4231_v10, %v3118_v11  ;;  %v4195_v19 = vld [vmem:[#allocation5 + $0x144] sm:$0xf] }
  0x68   :  { %1823 = vmatpush.bf16.msra.mxu3 %v3281_v60  ;;  %v2846_v18 = vld [vmem:[#allocation5 + $0x50] sm:$0xf0]  ;;  %v3249_v20 = vor.u32 %v4263_v12, %v3246_v13  ;;  %v4227_v22 = vld [vmem:[#allocation5 + $0x244] sm:$0xf] }
  0x69   :  { %1785 = vmatpush.bf16.msra.mxu0 %v2881_v2  ;;  %v2974_v21 = vld [vmem:[#allocation5 + $0x150] sm:$0xf0]  ;;  %v4259_v24 = vld [vmem:[#allocation5 + $0x344] sm:$0xf]  ;;  %v2849_v28 = vor.u32 %v4163_v17, %v2846_v18 }
  0x6a   :  { %1798 = vmatpush.bf16.msra.mxu1 %v3009_v3  ;;  %v3102_v23 = vld [vmem:[#allocation5 + $0x250] sm:$0xf0]  ;;  %v2977_v29 = vor.u32 %v4195_v19, %v2974_v21  ;;  %v4159_v33 = vld [vmem:[#allocation5 + $0x24] sm:$0xf] }
  0x6b   :  { %1811 = vmatpush.bf16.msra.mxu2 %v3137_v4  ;;  %v3230_v27 = vld [vmem:[#allocation5 + $0x350] sm:$0xf0]  ;;  %v3105_v30 = vor.u32 %v4227_v22, %v3102_v23  ;;  %v4191_v35 = vld [vmem:[#allocation5 + $0x124] sm:$0xf] }
  0x6c   :  { %1824 = vmatpush.bf16.msra.mxu3 %v3265_v8  ;;  %v2830_v34 = vld [vmem:[#allocation5 + $0x30] sm:$0xf0]  ;;  %v3233_v37 = vor.u32 %v4259_v24, %v3230_v27  ;;  %v4223_v41 = vld [vmem:[#allocation5 + $0x224] sm:$0xf] }
  0x6d   :  { %1786 = vmatpush.bf16.msra.mxu0 %v2865_v14  ;;  %v2958_v38 = vld [vmem:[#allocation5 + $0x130] sm:$0xf0]  ;;  %v4255_v44 = vld [vmem:[#allocation5 + $0x324] sm:$0xf]  ;;  %v2833_v46 = vor.u32 %v4159_v33, %v2830_v34 }
  0x6e   :  { %1799 = vmatpush.bf16.msra.mxu1 %v2993_v15  ;;  %v3086_v43 = vld [vmem:[#allocation5 + $0x230] sm:$0xf0]  ;;  %v4155_v47 = vld [vmem:[#allocation5 + $0x4] sm:$0xf]  ;;  %v2961_v49 = vor.u32 %v4191_v35, %v2958_v38 }
  0x6f   :  { %1812 = vmatpush.bf16.msra.mxu2 %v3121_v16  ;;  %v3214_v45 = vld [vmem:[#allocation5 + $0x330] sm:$0xf0]  ;;  %v3089_v50 = vor.u32 %v4223_v41, %v3086_v43  ;;  %v4187_v51 = vld [vmem:[#allocation5 + $0x104] sm:$0xf] }
  0x70   :  { %1825 = vmatpush.bf16.msra.mxu3 %v3249_v20  ;;  %v2814_v48 = vld [vmem:[#allocation5 + $0x10] sm:$0xf0]  ;;  %v4219_v53 = vld [vmem:[#allocation5 + $0x204] sm:$0xf]  ;;  %v3217_v54 = vor.u32 %v4255_v44, %v3214_v45 }
  0x71   :  { %1787 = vmatpush.bf16.msra.mxu0 %v2849_v28  ;;  %v2942_v52 = vld [vmem:[#allocation5 + $0x110] sm:$0xf0]  ;;  %v4251_v56 = vld [vmem:[#allocation5 + $0x304] sm:$0xf]  ;;  %v2817_v61 = vor.u32 %v4155_v47, %v2814_v48 }
  0x72   :  { %1800 = vmatpush.bf16.msra.mxu1 %v2977_v29  ;;  %v3070_v55 = vld [vmem:[#allocation5 + $0x210] sm:$0xf0]  ;;  %v4311_v58 = vld [vmem:[#allocation5 + $0x4e4] sm:$0xf]  ;;  %v2945_v1 = vor.u32 %v4187_v51, %v2942_v52 }
  0x73   :  { %1813 = vmatpush.bf16.msra.mxu2 %v3105_v30  ;;  %v3198_v57 = vld [vmem:[#allocation5 + $0x310] sm:$0xf0]  ;;  %v4343_v60 = vld [vmem:[#allocation5 + $0x5e4] sm:$0xf]  ;;  %v3073_v2 = vor.u32 %v4219_v53, %v3070_v55 }
  0x74   :  { %1826 = vmatpush.bf16.msra.mxu3 %v3233_v37  ;;  %v3438_v59 = vld [vmem:[#allocation5 + $0x4f0] sm:$0xf0]  ;;  %v4375_v63 = vld [vmem:[#allocation5 + $0x6e4] sm:$0xf]  ;;  %v3201_v5 = vor.u32 %v4251_v56, %v3198_v57 }
  0x75   :  { %1788 = vmatpush.bf16.msra.mxu0 %v2833_v46  ;;  %v3566_v62 = vld [vmem:[#allocation5 + $0x5f0] sm:$0xf0]  ;;  %v4407_v3 = vld [vmem:[#allocation5 + $0x7e4] sm:$0xf]  ;;  %v3441_v6 = vor.u32 %v4311_v58, %v3438_v59 }
  0x76   :  { %v3694_v0 = vld [vmem:[#allocation5 + $0x6f0] sm:$0xf0]  ;;  %1801 = vmatpush.bf16.msra.mxu1 %v2961_v49  ;;  %v3569_v7 = vor.u32 %v4343_v60, %v3566_v62  ;;  %v4307_v9 = vld [vmem:[#allocation5 + $0x4c4] sm:$0xf] }
  0x77   :  { %1814 = vmatpush.bf16.msra.mxu2 %v3089_v50  ;;  %v3822_v4 = vld [vmem:[#allocation5 + $0x7f0] sm:$0xf0]  ;;  %v3697_v8 = vor.u32 %v4375_v63, %v3694_v0  ;;  %v4339_v11 = vld [vmem:[#allocation5 + $0x5c4] sm:$0xf] }
  0x78   :  { %1827 = vmatpush.bf16.msra.mxu3 %v3217_v54  ;;  %v3422_v10 = vld [vmem:[#allocation5 + $0x4d0] sm:$0xf0]  ;;  %v3825_v12 = vor.u32 %v4407_v3, %v3822_v4  ;;  %v4371_v14 = vld [vmem:[#allocation5 + $0x6c4] sm:$0xf] }
  0x79   :  { %1789 = vmatpush.bf16.msra.mxu0 %v2817_v61  ;;  %v3550_v13 = vld [vmem:[#allocation5 + $0x5d0] sm:$0xf0]  ;;  %v4403_v16 = vld [vmem:[#allocation5 + $0x7c4] sm:$0xf]  ;;  %v3425_v18 = vor.u32 %v4307_v9, %v3422_v10 }
  0x7a   :  { %v3678_v15 = vld [vmem:[#allocation5 + $0x6d0] sm:$0xf0]  ;;  %1802 = vmatpush.bf16.msra.mxu1 %v2945_v1  ;;  %v3553_v19 = vor.u32 %v4339_v11, %v3550_v13  ;;  %v4303_v21 = vld [vmem:[#allocation5 + $0x4a4] sm:$0xf] }
  0x7b   :  { %1815 = vmatpush.bf16.msra.mxu2 %v3073_v2  ;;  %v3806_v17 = vld [vmem:[#allocation5 + $0x7d0] sm:$0xf0]  ;;  %v3681_v20 = vor.u32 %v4371_v14, %v3678_v15  ;;  %v4335_v23 = vld [vmem:[#allocation5 + $0x5a4] sm:$0xf] }
  0x7c   :  { %1828 = vmatpush.bf16.msra.mxu3 %v3201_v5  ;;  %v3406_v22 = vld [vmem:[#allocation5 + $0x4b0] sm:$0xf0]  ;;  %v3809_v24 = vor.u32 %v4403_v16, %v3806_v17  ;;  %v4367_v28 = vld [vmem:[#allocation5 + $0x6a4] sm:$0xf]  ;;  %1790 = vmatmul.bf16.vlgmr.msra.gmra.mxu0 %v4730_v26 }
  0x7d   :  { %1834 = vmatpush.bf16.msrb.mxu0 %v3441_v6  ;;  %v3534_v27 = vld [vmem:[#allocation5 + $0x5b0] sm:$0xf0]  ;;  %v4399_v30 = vld [vmem:[#allocation5 + $0x7a4] sm:$0xf]  ;;  %v3409_v34 = vor.u32 %v4303_v21, %v3406_v22  ;;  %1803 = vmatmul.bf16.vlgmr.msra.gmra.mxu1 %v4734_v32 }
  0x7e   :  { %1847 = vmatpush.bf16.msrb.mxu1 %v3569_v7  ;;  %v3662_v29 = vld [vmem:[#allocation5 + $0x6b0] sm:$0xf0]  ;;  %1816 = vmatmul.bf16.vlgmr.msra.gmra.mxu2 %v4728_v25  ;;  %v3537_v35 = vor.u32 %v4335_v23, %v3534_v27  ;;  %v4299_v38 = vld [vmem:[#allocation5 + $0x484] sm:$0xf] }
  0x7f   :  { %1860 = vmatpush.bf16.msrb.mxu2 %v3697_v8  ;;  %v3790_v33 = vld [vmem:[#allocation5 + $0x7b0] sm:$0xf0]  ;;  %1829 = vmatmul.bf16.vlgmr.msra.gmra.mxu3 %v4732_v31  ;;  %v3665_v37 = vor.u32 %v4367_v28, %v3662_v29  ;;  %v4331_v43 = vld [vmem:[#allocation5 + $0x584] sm:$0xf] }
  0x80   :  { %1873 = vmatpush.bf16.msrb.mxu3 %v3825_v12  ;;  %v3390_v41 = vld [vmem:[#allocation5 + $0x490] sm:$0xf0]  ;;  %v3793_v44 = vor.u32 %v4399_v30, %v3790_v33  ;;  %v4363_v46 = vld [vmem:[#allocation5 + $0x684] sm:$0xf] }
  0x81   :  { %1835 = vmatpush.bf16.msrb.mxu0 %v3425_v18  ;;  %v3518_v45 = vld [vmem:[#allocation5 + $0x590] sm:$0xf0]  ;;  %v4395_v48 = vld [vmem:[#allocation5 + $0x784] sm:$0xf]  ;;  %v3393_v50 = vor.u32 %v4299_v38, %v3390_v41  ;;  %v2932_v41 = vld [vmem:[#allocation5 + $0xe8] sm:$0xf] }
  0x82   :  { %1848 = vmatpush.bf16.msrb.mxu1 %v3553_v19  ;;  %v3646_v47 = vld [vmem:[#allocation5 + $0x690] sm:$0xf0]  ;;  %v3521_v51 = vor.u32 %v4331_v43, %v3518_v45  ;;  %v4295_v53 = vld [vmem:[#allocation5 + $0x464] sm:$0xf]  ;;  %v4186_v43 = vld [vmem:[#allocation5 + $0xf4] sm:$0xf0] }
  0x83   :  { %1861 = vmatpush.bf16.msrb.mxu2 %v3681_v20  ;;  %v3774_v49 = vld [vmem:[#allocation5 + $0x790] sm:$0xf0]  ;;  %v3649_v52 = vor.u32 %v4363_v46, %v3646_v47  ;;  %v4327_v55 = vld [vmem:[#allocation5 + $0x564] sm:$0xf]  ;;  %v4218_v46 = vld [vmem:[#allocation5 + $0x1f4] sm:$0xf0] }
  0x84   :  { %1874 = vmatpush.bf16.msrb.mxu3 %v3809_v24  ;;  %v3374_v54 = vld [vmem:[#allocation5 + $0x470] sm:$0xf0]  ;;  %v3777_v56 = vor.u32 %v4395_v48, %v3774_v49  ;;  %v4359_v58 = vld [vmem:[#allocation5 + $0x664] sm:$0xf]  ;;  %v3188_v47 = vld [vmem:[#allocation5 + $0x2e8] sm:$0xf] }
  0x85   :  { %1836 = vmatpush.bf16.msrb.mxu0 %v3409_v34  ;;  %v3502_v57 = vld [vmem:[#allocation5 + $0x570] sm:$0xf0]  ;;  %v4391_v60 = vld [vmem:[#allocation5 + $0x764] sm:$0xf]  ;;  %v3377_v62 = vor.u32 %v4295_v53, %v3374_v54  ;;  %v4250_v48 = vld [vmem:[#allocation5 + $0x2f4] sm:$0xf0]  ;;  %v2933_v54 = vor.u32 %v4186_v43, %v2932_v41 }
  0x86   :  { %1849 = vmatpush.bf16.msrb.mxu1 %v3537_v35  ;;  %v3630_v59 = vld [vmem:[#allocation5 + $0x670] sm:$0xf0]  ;;  %v3505_v63 = vor.u32 %v4327_v55, %v3502_v57  ;;  %v4291_v1 = vld [vmem:[#allocation5 + $0x444] sm:$0xf]  ;;  %v2916_v57 = vld [vmem:[#allocation5 + $0xc8] sm:$0xf] }
  0x87   :  { %1862 = vmatpush.bf16.msrb.mxu2 %v3665_v37  ;;  %v3758_v61 = vld [vmem:[#allocation5 + $0x770] sm:$0xf0]  ;;  %v3633_v0 = vor.u32 %v4359_v58, %v3630_v59  ;;  %v4323_v3 = vld [vmem:[#allocation5 + $0x544] sm:$0xf]  ;;  %v4182_v58 = vld [vmem:[#allocation5 + $0xd4] sm:$0xf0] }
  0x88   :  { %1875 = vmatpush.bf16.msrb.mxu3 %v3793_v44  ;;  %v3358_v2 = vld [vmem:[#allocation5 + $0x450] sm:$0xf0]  ;;  %v3761_v4 = vor.u32 %v4391_v60, %v3758_v61  ;;  %v4355_v6 = vld [vmem:[#allocation5 + $0x644] sm:$0xf]  ;;  %v3060_v44 = vld [vmem:[#allocation5 + $0x1e8] sm:$0xf] }
  0x89   :  { %1837 = vmatpush.bf16.msrb.mxu0 %v3393_v50  ;;  %v3486_v5 = vld [vmem:[#allocation5 + $0x550] sm:$0xf0]  ;;  %v4387_v8 = vld [vmem:[#allocation5 + $0x744] sm:$0xf]  ;;  %v3361_v10 = vor.u32 %v4291_v1, %v3358_v2  ;;  %v3061_v55 = vor.u32 %v4218_v46, %v3060_v44  ;;  %v3044_v59 = vld [vmem:[#allocation5 + $0x1c8] sm:$0xf]  ;;  %v2917_v2 = vor.u32 %v4182_v58, %v2916_v57 }
  0x8a   :  { %1850 = vmatpush.bf16.msrb.mxu1 %v3521_v51  ;;  %v3614_v7 = vld [vmem:[#allocation5 + $0x650] sm:$0xf0]  ;;  %v3489_v11 = vor.u32 %v4323_v3, %v3486_v5  ;;  %v4287_v13 = vld [vmem:[#allocation5 + $0x424] sm:$0xf]  ;;  %v3316_v51 = vld [vmem:[#allocation5 + $0x3e8] sm:$0xf] }
  0x8b   :  { %1863 = vmatpush.bf16.msrb.mxu2 %v3649_v52  ;;  %v3742_v9 = vld [vmem:[#allocation5 + $0x750] sm:$0xf0]  ;;  %v3617_v12 = vor.u32 %v4355_v6, %v3614_v7  ;;  %v4319_v15 = vld [vmem:[#allocation5 + $0x524] sm:$0xf]  ;;  %v4282_v52 = vld [vmem:[#allocation5 + $0x3f4] sm:$0xf0] }
  0x8c   :  { %1876 = vmatpush.bf16.msrb.mxu3 %v3777_v56  ;;  %v3342_v14 = vld [vmem:[#allocation5 + $0x430] sm:$0xf0]  ;;  %v3745_v16 = vor.u32 %v4387_v8, %v3742_v9  ;;  %v4351_v18 = vld [vmem:[#allocation5 + $0x624] sm:$0xf]  ;;  %v3189_v56 = vor.u32 %v4250_v48, %v3188_v47  ;;  %v3317_v60 = vor.u32 %v4282_v52, %v3316_v51  ;;  %v4214_v61 = vld [vmem:[#allocation5 + $0x1d4] sm:$0xf0] }
  0x8d   :  { %1838 = vmatpush.bf16.msrb.mxu0 %v3377_v62  ;;  %v3470_v17 = vld [vmem:[#allocation5 + $0x530] sm:$0xf0]  ;;  %v4383_v20 = vld [vmem:[#allocation5 + $0x724] sm:$0xf]  ;;  %v3345_v22 = vor.u32 %v4287_v13, %v3342_v14  ;;  %v3172_v62 = vld [vmem:[#allocation5 + $0x2c8] sm:$0xf]  ;;  %v3045_v3 = vor.u32 %v4214_v61, %v3044_v59 }
  0x8e   :  { %1851 = vmatpush.bf16.msrb.mxu1 %v3505_v63  ;;  %v3598_v19 = vld [vmem:[#allocation5 + $0x630] sm:$0xf0]  ;;  %v4283_v23 = vld [vmem:[#allocation5 + $0x404] sm:$0xf]  ;;  %v3473_v27 = vor.u32 %v4319_v15, %v3470_v17  ;;  %v4246_v63 = vld [vmem:[#allocation5 + $0x2d4] sm:$0xf0] }
  0x8f   :  { %1864 = vmatpush.bf16.msrb.mxu2 %v3633_v0  ;;  %v3726_v21 = vld [vmem:[#allocation5 + $0x730] sm:$0xf0]  ;;  %v3601_v28 = vor.u32 %v4351_v18, %v3598_v19  ;;  %v4315_v29 = vld [vmem:[#allocation5 + $0x504] sm:$0xf]  ;;  %v3300_v0 = vld [vmem:[#allocation5 + $0x3c8] sm:$0xf] }
  0x90   :  { %1877 = vmatpush.bf16.msrb.mxu3 %v3761_v4  ;;  %v3326_v24 = vld [vmem:[#allocation5 + $0x410] sm:$0xf0]  ;;  %v4347_v33 = vld [vmem:[#allocation5 + $0x604] sm:$0xf]  ;;  %v3729_v34 = vor.u32 %v4383_v20, %v3726_v21  ;;  %v4278_v1 = vld [vmem:[#allocation5 + $0x3d4] sm:$0xf0]  ;;  %v3173_v4 = vor.u32 %v4246_v63, %v3172_v62 }
  0x91   :  { %1839 = vmatpush.bf16.msrb.mxu0 %v3361_v10  ;;  %v3454_v30 = vld [vmem:[#allocation5 + $0x510] sm:$0xf0]  ;;  %v4379_v37 = vld [vmem:[#allocation5 + $0x704] sm:$0xf]  ;;  %v3329_v45 = vor.u32 %v4283_v23, %v3326_v24  ;;  %v2900_v5 = vld [vmem:[#allocation5 + $0xa8] sm:$0xf]  ;;  %v3301_v8 = vor.u32 %v4278_v1, %v3300_v0 }
  0x92   :  { %1852 = vmatpush.bf16.msrb.mxu1 %v3489_v11  ;;  %v3582_v35 = vld [vmem:[#allocation5 + $0x610] sm:$0xf0]  ;;  %v3457_v49 = vor.u32 %v4315_v29, %v3454_v30  ;;  %v4178_v6 = vld [vmem:[#allocation5 + $0xb4] sm:$0xf0]  ;;  %v3028_v7 = vld [vmem:[#allocation5 + $0x1a8] sm:$0xf] }
  0x93   :  { %1865 = vmatpush.bf16.msrb.mxu2 %v3617_v12  ;;  %v3710_v38 = vld [vmem:[#allocation5 + $0x710] sm:$0xf0]  ;;  %v3585_v50 = vor.u32 %v4347_v33, %v3582_v35  ;;  %v4210_v9 = vld [vmem:[#allocation5 + $0x1b4] sm:$0xf0]  ;;  %v3156_v10 = vld [vmem:[#allocation5 + $0x2a8] sm:$0xf]  ;;  %v2901_v14 = vor.u32 %v4178_v6, %v2900_v5 }
  0x94   :  { %1878 = vmatpush.bf16.msrb.mxu3 %v3745_v16  ;;  %v3713_v53 = vor.u32 %v4379_v37, %v3710_v38  ;;  %v4242_v11 = vld [vmem:[#allocation5 + $0x2b4] sm:$0xf0]  ;;  %v3284_v12 = vld [vmem:[#allocation5 + $0x3a8] sm:$0xf]  ;;  %v3029_v15 = vor.u32 %v4210_v9, %v3028_v7 }
  0x95   :  { %1840 = vmatpush.bf16.msrb.mxu0 %v3345_v22  ;;  %v4274_v13 = vld [vmem:[#allocation5 + $0x3b4] sm:$0xf0]  ;;  %v3157_v16 = vor.u32 %v4242_v11, %v3156_v10  ;;  %v2884_v17 = vld [vmem:[#allocation5 + $0x88] sm:$0xf] }
  0x96   :  { %1853 = vmatpush.bf16.msrb.mxu1 %v3473_v27  ;;  %v4174_v18 = vld [vmem:[#allocation5 + $0x94] sm:$0xf0]  ;;  %v3012_v19 = vld [vmem:[#allocation5 + $0x188] sm:$0xf]  ;;  %v3285_v20 = vor.u32 %v4274_v13, %v3284_v12 }
  0x97   :  { %1866 = vmatpush.bf16.msrb.mxu2 %v3601_v28  ;;  %v4206_v21 = vld [vmem:[#allocation5 + $0x194] sm:$0xf0]  ;;  %v3140_v22 = vld [vmem:[#allocation5 + $0x288] sm:$0xf]  ;;  %v2885_v28 = vor.u32 %v4174_v18, %v2884_v17 }
  0x98   :  { %1879 = vmatpush.bf16.msrb.mxu3 %v3729_v34  ;;  %v4238_v23 = vld [vmem:[#allocation5 + $0x294] sm:$0xf0]  ;;  %v3268_v24 = vld [vmem:[#allocation5 + $0x388] sm:$0xf]  ;;  %v3013_v29 = vor.u32 %v4206_v21, %v3012_v19 }
  0x99   :  { %1841 = vmatpush.bf16.msrb.mxu0 %v3329_v45  ;;  %v4270_v27 = vld [vmem:[#allocation5 + $0x394] sm:$0xf0]  ;;  %v3141_v30 = vor.u32 %v4238_v23, %v3140_v22  ;;  %v2868_v33 = vld [vmem:[#allocation5 + $0x68] sm:$0xf] }
  0x9a   :  { %1854 = vmatpush.bf16.msrb.mxu1 %v3457_v49  ;;  %v4170_v34 = vld [vmem:[#allocation5 + $0x74] sm:$0xf0]  ;;  %v2996_v35 = vld [vmem:[#allocation5 + $0x168] sm:$0xf]  ;;  %v3269_v37 = vor.u32 %v4270_v27, %v3268_v24 }
  0x9b   :  { %1867 = vmatpush.bf16.msrb.mxu2 %v3585_v50  ;;  %v4202_v38 = vld [vmem:[#allocation5 + $0x174] sm:$0xf0]  ;;  %v3124_v41 = vld [vmem:[#allocation5 + $0x268] sm:$0xf]  ;;  %v2869_v46 = vor.u32 %v4170_v34, %v2868_v33 }
  0x9c   :  { %1880 = vmatpush.bf16.msrb.mxu3 %v3713_v53  ;;  %1842 = vmatmul.bf16.vlgmr.msrb.gmra.mxu0 %v4742_v39  ;;  %v4234_v43 = vld [vmem:[#allocation5 + $0x274] sm:$0xf0]  ;;  %v3252_v44 = vld [vmem:[#allocation5 + $0x368] sm:$0xf]  ;;  %v2997_v47 = vor.u32 %v4202_v38, %v2996_v35 }
  0x9d   :  { %1886 = vmatpush.bf16.msra.mxu0 %v2933_v54  ;;  %1855 = vmatmul.bf16.vlgmr.msrb.gmra.mxu1 %v4746_v42  ;;  %v4266_v45 = vld [vmem:[#allocation5 + $0x374] sm:$0xf0]  ;;  %v3125_v48 = vor.u32 %v4234_v43, %v3124_v41  ;;  %v2852_v49 = vld [vmem:[#allocation5 + $0x48] sm:$0xf] }
  0x9e   :  { %1899 = vmatpush.bf16.msra.mxu1 %v3061_v55  ;;  %1868 = vmatmul.bf16.vlgmr.msrb.gmra.mxu2 %v4740_v36  ;;  %v4166_v50 = vld [vmem:[#allocation5 + $0x54] sm:$0xf0]  ;;  %v2980_v51 = vld [vmem:[#allocation5 + $0x148] sm:$0xf]  ;;  %v3253_v52 = vor.u32 %v4266_v45, %v3252_v44 }
  0x9f   :  { %1912 = vmatpush.bf16.msra.mxu2 %v3189_v56  ;;  %1881 = vmatmul.bf16.vlgmr.msrb.gmra.mxu3 %v4744_v40  ;;  %v4198_v53 = vld [vmem:[#allocation5 + $0x154] sm:$0xf0]  ;;  %v3108_v54 = vld [vmem:[#allocation5 + $0x248] sm:$0xf]  ;;  %v2853_v58 = vor.u32 %v4166_v50, %v2852_v49 }
  0xa0   :  { %1925 = vmatpush.bf16.msra.mxu3 %v3317_v60  ;;  %v4230_v55 = vld [vmem:[#allocation5 + $0x254] sm:$0xf0]  ;;  %v3236_v56 = vld [vmem:[#allocation5 + $0x348] sm:$0xf]  ;;  %v2981_v59 = vor.u32 %v4198_v53, %v2980_v51 }
  0xa1   :  { %1887 = vmatpush.bf16.msra.mxu0 %v2917_v2  ;;  %v4262_v57 = vld [vmem:[#allocation5 + $0x354] sm:$0xf0]  ;;  %v3109_v60 = vor.u32 %v4230_v55, %v3108_v54  ;;  %v2836_v61 = vld [vmem:[#allocation5 + $0x28] sm:$0xf] }
  0xa2   :  { %1900 = vmatpush.bf16.msra.mxu1 %v3045_v3  ;;  %v4162_v62 = vld [vmem:[#allocation5 + $0x34] sm:$0xf0]  ;;  %v2964_v63 = vld [vmem:[#allocation5 + $0x128] sm:$0xf]  ;;  %v3237_v0 = vor.u32 %v4262_v57, %v3236_v56 }
  0xa3   :  { %1913 = vmatpush.bf16.msra.mxu2 %v3173_v4  ;;  %v4194_v1 = vld [vmem:[#allocation5 + $0x134] sm:$0xf0]  ;;  %v3092_v2 = vld [vmem:[#allocation5 + $0x228] sm:$0xf]  ;;  %v2837_v6 = vor.u32 %v4162_v62, %v2836_v61 }
  0xa4   :  { %1926 = vmatpush.bf16.msra.mxu3 %v3301_v8  ;;  %v4226_v3 = vld [vmem:[#allocation5 + $0x234] sm:$0xf0]  ;;  %v3220_v4 = vld [vmem:[#allocation5 + $0x328] sm:$0xf]  ;;  %v2965_v9 = vor.u32 %v4194_v1, %v2964_v63 }
  0xa5   :  { %1888 = vmatpush.bf16.msra.mxu0 %v2901_v14  ;;  %v4258_v5 = vld [vmem:[#allocation5 + $0x334] sm:$0xf0]  ;;  %v2820_v7 = vld [vmem:[#allocation5 + $0x8] sm:$0xf]  ;;  %v3093_v10 = vor.u32 %v4226_v3, %v3092_v2 }
  0xa6   :  { %1901 = vmatpush.bf16.msra.mxu1 %v3029_v15  ;;  %v4158_v8 = vld [vmem:[#allocation5 + $0x14] sm:$0xf0]  ;;  %v2948_v11 = vld [vmem:[#allocation5 + $0x108] sm:$0xf]  ;;  %v3221_v14 = vor.u32 %v4258_v5, %v3220_v4 }
  0xa7   :  { %1914 = vmatpush.bf16.msra.mxu2 %v3157_v16  ;;  %v4190_v12 = vld [vmem:[#allocation5 + $0x114] sm:$0xf0]  ;;  %v3076_v13 = vld [vmem:[#allocation5 + $0x208] sm:$0xf]  ;;  %v2821_v21 = vor.u32 %v4158_v8, %v2820_v7 }
  0xa8   :  { %1927 = vmatpush.bf16.msra.mxu3 %v3285_v20  ;;  %v4222_v15 = vld [vmem:[#allocation5 + $0x214] sm:$0xf0]  ;;  %v3204_v16 = vld [vmem:[#allocation5 + $0x308] sm:$0xf]  ;;  %v2949_v27 = vor.u32 %v4190_v12, %v2948_v11 }
  0xa9   :  { %1889 = vmatpush.bf16.msra.mxu0 %v2885_v28  ;;  %v4254_v17 = vld [vmem:[#allocation5 + $0x314] sm:$0xf0]  ;;  %v3444_v18 = vld [vmem:[#allocation5 + $0x4e8] sm:$0xf]  ;;  %v3077_v28 = vor.u32 %v4222_v15, %v3076_v13 }
  0xaa   :  { %1902 = vmatpush.bf16.msra.mxu1 %v3013_v29  ;;  %v4314_v19 = vld [vmem:[#allocation5 + $0x4f4] sm:$0xf0]  ;;  %v3572_v20 = vld [vmem:[#allocation5 + $0x5e8] sm:$0xf]  ;;  %v3205_v33 = vor.u32 %v4254_v17, %v3204_v16 }
  0xab   :  { %1915 = vmatpush.bf16.msra.mxu2 %v3141_v30  ;;  %v4346_v22 = vld [vmem:[#allocation5 + $0x5f4] sm:$0xf0]  ;;  %v3700_v23 = vld [vmem:[#allocation5 + $0x6e8] sm:$0xf]  ;;  %v3445_v34 = vor.u32 %v4314_v19, %v3444_v18 }
  0xac   :  { %1928 = vmatpush.bf16.msra.mxu3 %v3269_v37  ;;  %v4378_v24 = vld [vmem:[#allocation5 + $0x6f4] sm:$0xf0]  ;;  %v3828_v29 = vld [vmem:[#allocation5 + $0x7e8] sm:$0xf]  ;;  %v3573_v35 = vor.u32 %v4346_v22, %v3572_v20 }
  0xad   :  { %1890 = vmatpush.bf16.msra.mxu0 %v2869_v46  ;;  %v4410_v30 = vld [vmem:[#allocation5 + $0x7f4] sm:$0xf0]  ;;  %v3701_v37 = vor.u32 %v4378_v24, %v3700_v23  ;;  %v3428_v38 = vld [vmem:[#allocation5 + $0x4c8] sm:$0xf] }
  0xae   :  { %1903 = vmatpush.bf16.msra.mxu1 %v2997_v47  ;;  %v4310_v41 = vld [vmem:[#allocation5 + $0x4d4] sm:$0xf0]  ;;  %v3556_v43 = vld [vmem:[#allocation5 + $0x5c8] sm:$0xf]  ;;  %v3829_v44 = vor.u32 %v4410_v30, %v3828_v29  ;;  %v4764_v30 = vld [vmem:[#allocation7] sm:$0xf] }
  0xaf   :  { %1916 = vmatpush.bf16.msra.mxu2 %v3125_v48  ;;  %v4342_v45 = vld [vmem:[#allocation5 + $0x5d4] sm:$0xf0]  ;;  %v3684_v46 = vld [vmem:[#allocation5 + $0x6c8] sm:$0xf]  ;;  %v3429_v50 = vor.u32 %v4310_v41, %v3428_v38 }
  0xb0   :  { %1929 = vmatpush.bf16.msra.mxu3 %v3253_v52  ;;  %v4374_v47 = vld [vmem:[#allocation5 + $0x6d4] sm:$0xf0]  ;;  %v3812_v48 = vld [vmem:[#allocation5 + $0x7c8] sm:$0xf]  ;;  %v3557_v51 = vor.u32 %v4342_v45, %v3556_v43 }
  0xb1   :  { %1891 = vmatpush.bf16.msra.mxu0 %v2853_v58  ;;  %v4406_v49 = vld [vmem:[#allocation5 + $0x7d4] sm:$0xf0]  ;;  %v3685_v52 = vor.u32 %v4374_v47, %v3684_v46  ;;  %v3412_v53 = vld [vmem:[#allocation5 + $0x4a8] sm:$0xf] }
  0xb2   :  { %1904 = vmatpush.bf16.msra.mxu1 %v2981_v59  ;;  %v4306_v54 = vld [vmem:[#allocation5 + $0x4b4] sm:$0xf0]  ;;  %v3540_v55 = vld [vmem:[#allocation5 + $0x5a8] sm:$0xf]  ;;  %v3813_v56 = vor.u32 %v4406_v49, %v3812_v48 }
  0xb3   :  { %1917 = vmatpush.bf16.msra.mxu2 %v3109_v60  ;;  %v4338_v57 = vld [vmem:[#allocation5 + $0x5b4] sm:$0xf0]  ;;  %v3668_v58 = vld [vmem:[#allocation5 + $0x6a8] sm:$0xf]  ;;  %v3413_v62 = vor.u32 %v4306_v54, %v3412_v53 }
  0xb4   :  { %1930 = vmatpush.bf16.msra.mxu3 %v3237_v0  ;;  %v4370_v59 = vld [vmem:[#allocation5 + $0x6b4] sm:$0xf0]  ;;  %v3796_v60 = vld [vmem:[#allocation5 + $0x7a8] sm:$0xf]  ;;  %v3541_v63 = vor.u32 %v4338_v57, %v3540_v55 }
  0xb5   :  { %1892 = vmatpush.bf16.msra.mxu0 %v2837_v6  ;;  %v4402_v61 = vld [vmem:[#allocation5 + $0x7b4] sm:$0xf0]  ;;  %v3669_v0 = vor.u32 %v4370_v59, %v3668_v58  ;;  %v3396_v1 = vld [vmem:[#allocation5 + $0x488] sm:$0xf] }
  0xb6   :  { %1905 = vmatpush.bf16.msra.mxu1 %v2965_v9  ;;  %v4302_v2 = vld [vmem:[#allocation5 + $0x494] sm:$0xf0]  ;;  %v3524_v3 = vld [vmem:[#allocation5 + $0x588] sm:$0xf]  ;;  %v3797_v4 = vor.u32 %v4402_v61, %v3796_v60 }
  0xb7   :  { %1918 = vmatpush.bf16.msra.mxu2 %v3093_v10  ;;  %v4334_v5 = vld [vmem:[#allocation5 + $0x594] sm:$0xf0]  ;;  %v3652_v6 = vld [vmem:[#allocation5 + $0x688] sm:$0xf]  ;;  %v3397_v10 = vor.u32 %v4302_v2, %v3396_v1 }
  0xb8   :  { %1931 = vmatpush.bf16.msra.mxu3 %v3221_v14  ;;  %v4366_v7 = vld [vmem:[#allocation5 + $0x694] sm:$0xf0]  ;;  %v3780_v8 = vld [vmem:[#allocation5 + $0x788] sm:$0xf]  ;;  %v3525_v11 = vor.u32 %v4334_v5, %v3524_v3 }
  0xb9   :  { %1893 = vmatpush.bf16.msra.mxu0 %v2821_v21  ;;  %v4398_v9 = vld [vmem:[#allocation5 + $0x794] sm:$0xf0]  ;;  %v3653_v12 = vor.u32 %v4366_v7, %v3652_v6  ;;  %v3380_v13 = vld [vmem:[#allocation5 + $0x468] sm:$0xf] }
  0xba   :  { %1906 = vmatpush.bf16.msra.mxu1 %v2949_v27  ;;  %v4298_v14 = vld [vmem:[#allocation5 + $0x474] sm:$0xf0]  ;;  %v3508_v15 = vld [vmem:[#allocation5 + $0x568] sm:$0xf]  ;;  %v3781_v16 = vor.u32 %v4398_v9, %v3780_v8  ;;  %v4184_v8 = vld [vmem:[#allocation5 + $0xec] sm:$0xf] }
  0xbb   :  { %1919 = vmatpush.bf16.msra.mxu2 %v3077_v28  ;;  %v4330_v17 = vld [vmem:[#allocation5 + $0x574] sm:$0xf0]  ;;  %v3636_v18 = vld [vmem:[#allocation5 + $0x668] sm:$0xf]  ;;  %v3381_v22 = vor.u32 %v4298_v14, %v3380_v13  ;;  %v2934_v9 = vld [vmem:[#allocation5 + $0xf8] sm:$0xf0] }
  0xbc   :  { %1932 = vmatpush.bf16.msra.mxu3 %v3205_v33  ;;  %1894 = vmatmul.bf16.vlgmr.msra.gmra.mxu0 %v4730_v26  ;;  %v4362_v19 = vld [vmem:[#allocation5 + $0x674] sm:$0xf0]  ;;  %v3764_v20 = vld [vmem:[#allocation5 + $0x768] sm:$0xf]  ;;  %v3509_v24 = vor.u32 %v4330_v17, %v3508_v15  ;;  %v3062_v13 = vld [vmem:[#allocation5 + $0x1f8] sm:$0xf0] }
  0xbd   :  { %1938 = vmatpush.bf16.msrb.mxu0 %v3445_v34  ;;  %1907 = vmatmul.bf16.vlgmr.msra.gmra.mxu1 %v4734_v32  ;;  %v4394_v21 = vld [vmem:[#allocation5 + $0x774] sm:$0xf0]  ;;  %v3364_v23 = vld [vmem:[#allocation5 + $0x448] sm:$0xf]  ;;  %v3637_v27 = vor.u32 %v4362_v19, %v3636_v18  ;;  %v4248_v14 = vld [vmem:[#allocation5 + $0x2ec] sm:$0xf] }
  0xbe   :  { %1951 = vmatpush.bf16.msrb.mxu1 %v3573_v35  ;;  %1920 = vmatmul.bf16.vlgmr.msra.gmra.mxu2 %v4728_v25  ;;  %v4294_v28 = vld [vmem:[#allocation5 + $0x454] sm:$0xf0]  ;;  %v3492_v29 = vld [vmem:[#allocation5 + $0x548] sm:$0xf]  ;;  %v3765_v33 = vor.u32 %v4394_v21, %v3764_v20  ;;  %v3190_v15 = vld [vmem:[#allocation5 + $0x2f8] sm:$0xf0] }
  0xbf   :  { %1964 = vmatpush.bf16.msrb.mxu2 %v3701_v37  ;;  %1933 = vmatmul.bf16.vlgmr.msra.gmra.mxu3 %v4732_v31  ;;  %v4326_v34 = vld [vmem:[#allocation5 + $0x554] sm:$0xf0]  ;;  %v3620_v35 = vld [vmem:[#allocation5 + $0x648] sm:$0xf]  ;;  %v3365_v43 = vor.u32 %v4294_v28, %v3364_v23  ;;  %v4280_v19 = vld [vmem:[#allocation5 + $0x3ec] sm:$0xf] }
  0xc0   :  { %1977 = vmatpush.bf16.msrb.mxu3 %v3829_v44  ;;  %v4358_v37 = vld [vmem:[#allocation5 + $0x654] sm:$0xf0]  ;;  %v3748_v38 = vld [vmem:[#allocation5 + $0x748] sm:$0xf]  ;;  %v390_v44 = vperm.slane %v4764_v30, 0  ;;  %v3493_v45 = vor.u32 %v4326_v34, %v3492_v29 }
  0xc1   :  { %1939 = vmatpush.bf16.msrb.mxu0 %v3429_v50  ;;  %v4390_v41 = vld [vmem:[#allocation5 + $0x754] sm:$0xf0]  ;;  %v3621_v46 = vor.u32 %v4358_v37, %v3620_v35  ;;  %v3348_v47 = vld [vmem:[#allocation5 + $0x428] sm:$0xf]  ;;  %v3318_v20 = vld [vmem:[#allocation5 + $0x3f8] sm:$0xf0] }
  0xc2   :  { %1952 = vmatpush.bf16.msrb.mxu1 %v3557_v51  ;;  %v4290_v48 = vld [vmem:[#allocation5 + $0x434] sm:$0xf0]  ;;  %v3476_v49 = vld [vmem:[#allocation5 + $0x528] sm:$0xf]  ;;  %v3749_v50 = vor.u32 %v4390_v41, %v3748_v38  ;;  %v4180_v28 = vld [vmem:[#allocation5 + $0xcc] sm:$0xf]  ;;  %v3321_v37 = vor.u32 %v4280_v19, %v3318_v20 }
  0xc3   :  { %1965 = vmatpush.bf16.msrb.mxu2 %v3685_v52  ;;  %v4322_v51 = vld [vmem:[#allocation5 + $0x534] sm:$0xf0]  ;;  %v3604_v52 = vld [vmem:[#allocation5 + $0x628] sm:$0xf]  ;;  %v3349_v57 = vor.u32 %v4290_v48, %v3348_v47  ;;  %v2918_v29 = vld [vmem:[#allocation5 + $0xd8] sm:$0xf0] }
  0xc4   :  { %1978 = vmatpush.bf16.msrb.mxu3 %v3813_v56  ;;  %v4354_v53 = vld [vmem:[#allocation5 + $0x634] sm:$0xf0]  ;;  %v3732_v54 = vld [vmem:[#allocation5 + $0x728] sm:$0xf]  ;;  %v3046_v38 = vld [vmem:[#allocation5 + $0x1d8] sm:$0xf0]  ;;  %v2921_v47 = vor.u32 %v4180_v28, %v2918_v29 }
  0xc5   :  { %1940 = vmatpush.bf16.msrb.mxu0 %v3413_v62  ;;  %v4386_v55 = vld [vmem:[#allocation5 + $0x734] sm:$0xf0]  ;;  %v3332_v58 = vld [vmem:[#allocation5 + $0x408] sm:$0xf]  ;;  %v3477_v62 = vor.u32 %v4322_v51, %v3476_v49  ;;  %v4244_v41 = vld [vmem:[#allocation5 + $0x2cc] sm:$0xf] }
  0xc6   :  { %1953 = vmatpush.bf16.msrb.mxu1 %v3541_v63  ;;  %v4286_v59 = vld [vmem:[#allocation5 + $0x414] sm:$0xf0]  ;;  %v3605_v63 = vor.u32 %v4354_v53, %v3604_v52  ;;  %v3588_v2 = vld [vmem:[#allocation5 + $0x608] sm:$0xf]  ;;  %v3733_v3 = vor.u32 %v4386_v55, %v3732_v54  ;;  %v2902_v51 = vld [vmem:[#allocation5 + $0xb8] sm:$0xf0] }
  0xc7   :  { %1966 = vmatpush.bf16.msrb.mxu2 %v3669_v0  ;;  %v3460_v0 = vld [vmem:[#allocation5 + $0x508] sm:$0xf]  ;;  %v4318_v1 = vld [vmem:[#allocation5 + $0x514] sm:$0xf0]  ;;  %v4208_v52 = vld [vmem:[#allocation5 + $0x1ac] sm:$0xf] }
  0xc8   :  { %1979 = vmatpush.bf16.msrb.mxu3 %v3797_v4  ;;  %v4350_v4 = vld [vmem:[#allocation5 + $0x614] sm:$0xf0]  ;;  %v3716_v5 = vld [vmem:[#allocation5 + $0x708] sm:$0xf]  ;;  %v3461_v17 = vor.u32 %v4318_v1, %v3460_v0  ;;  %v3030_v55 = vld [vmem:[#allocation5 + $0x1b8] sm:$0xf0] }
  0xc9   :  { %1941 = vmatpush.bf16.msrb.mxu0 %v3397_v10  ;;  %v4382_v6 = vld [vmem:[#allocation5 + $0x714] sm:$0xf0]  ;;  %v4216_v10 = vld [vmem:[#allocation5 + $0x1ec] sm:$0xf]  ;;  %v3589_v18 = vor.u32 %v4350_v4, %v3588_v2  ;;  %v2886_v1 = vld [vmem:[#allocation5 + $0x98] sm:$0xf0] }
  0xca   :  { %1954 = vmatpush.bf16.msrb.mxu1 %v3525_v11  ;;  %v3717_v21 = vor.u32 %v4382_v6, %v3716_v5  ;;  %v4172_v0 = vld [vmem:[#allocation5 + $0x8c] sm:$0xf]  ;;  %v3014_v4 = vld [vmem:[#allocation5 + $0x198] sm:$0xf0] }
  0xcb   :  { %1967 = vmatpush.bf16.msrb.mxu2 %v3653_v12  ;;  %v1687_v56 = vpop.f32.mrf.mxu0  ;;  %v3333_v12 = vor.u32 %v4286_v59, %v3332_v58  ;;  %v4272_v58 = vld [vmem:[#allocation5 + $0x3ac] sm:$0xf]  ;;  %v3286_v59 = vld [vmem:[#allocation5 + $0x3b8] sm:$0xf0] }
  0xcc   :  { %1980 = vmatpush.bf16.msrb.mxu3 %v3781_v16  ;;  %v1688_v60 = vadd.f32 %v1687_v56, %v390_v44  ;;  %v1700_v61 = vpop.f32.mrf.mxu1  ;;  %v4240_v56 = vld [vmem:[#allocation5 + $0x2ac] sm:$0xf]  ;;  %v3142_v6 = vld [vmem:[#allocation5 + $0x298] sm:$0xf0] }
  0xcd   :  { %1942 = vmatpush.bf16.msrb.mxu0 %v3381_v22  ;;  %v2937_v22 = vor.u32 %v4184_v8, %v2934_v9  ;;  %v4204_v2 = vld [vmem:[#allocation5 + $0x18c] sm:$0xf]  ;;  %v3270_v8 = vld [vmem:[#allocation5 + $0x398] sm:$0xf0]  ;;  %v2889_v9 = vor.u32 %v4172_v0, %v2886_v1 }
  0xce   :  { %1955 = vmatpush.bf16.msrb.mxu1 %v3509_v24  ;;  %v1701_v7 = vadd.f32 %v1700_v61, %v1688_v60  ;;  %v3065_v24 = vor.u32 %v4216_v10, %v3062_v13  ;;  %v4236_v5 = vld [vmem:[#allocation5 + $0x28c] sm:$0xf]  ;;  %v2998_v19 = vld [vmem:[#allocation5 + $0x178] sm:$0xf0] }
  0xcf   :  { %1968 = vmatpush.bf16.msrb.mxu2 %v3637_v27  ;;  %v3193_v27 = vor.u32 %v4248_v14, %v3190_v15  ;;  %v4168_v13 = vld [vmem:[#allocation5 + $0x6c] sm:$0xf]  ;;  %v2870_v14 = vld [vmem:[#allocation5 + $0x78] sm:$0xf0] }
  0xd0   :  { %1981 = vmatpush.bf16.msrb.mxu3 %v3765_v33  ;;  %v1713_v11 = vpop.f32.mrf.mxu2  ;;  %v4212_v33 = vld [vmem:[#allocation5 + $0x1cc] sm:$0xf] }
  0xd1   :  { %1943 = vmatpush.bf16.msrb.mxu0 %v3365_v43  ;;  %v1714_v16 = vadd.f32 %v1713_v11, %v1701_v7  ;;  %v1726_v23 = vpop.f32.mrf.mxu3  ;;  %v3174_v43 = vld [vmem:[#allocation5 + $0x2d8] sm:$0xf0]  ;;  %v3049_v48 = vor.u32 %v4212_v33, %v3046_v38  ;;  %v4268_v7 = vld [vmem:[#allocation5 + $0x38c] sm:$0xf]  ;;  %v3017_v11 = vor.u32 %v4204_v2, %v3014_v4 }
  0xd2   :  { %1956 = vmatpush.bf16.msrb.mxu1 %v3493_v45  ;;  %v4276_v45 = vld [vmem:[#allocation5 + $0x3cc] sm:$0xf]  ;;  %v3177_v49 = vor.u32 %v4244_v41, %v3174_v43  ;;  %v2982_v41 = vld [vmem:[#allocation5 + $0x158] sm:$0xf0] }
  0xd3   :  { %1969 = vmatpush.bf16.msrb.mxu2 %v3621_v46  ;;  %v1727_v34 = vadd.f32 %v1726_v23, %v1714_v16  ;;  %v1689_v35 = vpop.f32.mrf.mxu0  ;;  %v3302_v46 = vld [vmem:[#allocation5 + $0x3d8] sm:$0xf0]  ;;  %v4200_v15 = vld [vmem:[#allocation5 + $0x16c] sm:$0xf] }
  0xd4   :  { %1982 = vmatpush.bf16.msrb.mxu3 %v3749_v50  ;;  %v1702_v44 = vpop.f32.mrf.mxu1  ;;  %v4176_v50 = vld [vmem:[#allocation5 + $0xac] sm:$0xf]  ;;  %v3305_v54 = vor.u32 %v4276_v45, %v3302_v46  ;;  %v3254_v23 = vld [vmem:[#allocation5 + $0x378] sm:$0xf0]  ;;  %v3001_v28 = vor.u32 %v4200_v15, %v2998_v19 }
  0xd5   :  { %1944 = vmatpush.bf16.msrb.mxu0 %v3349_v57  ;;  %v3158_v57 = vld [vmem:[#allocation5 + $0x2b8] sm:$0xf0]  ;;  %v2905_v60 = vor.u32 %v4176_v50, %v2902_v51  ;;  %v4232_v20 = vld [vmem:[#allocation5 + $0x26c] sm:$0xf] }
  0xd6   :  { %1957 = vmatpush.bf16.msrb.mxu1 %v3477_v62  ;;  %v3033_v62 = vor.u32 %v4208_v52, %v3030_v55  ;;  %v4164_v33 = vld [vmem:[#allocation5 + $0x4c] sm:$0xf]  ;;  %v2854_v35 = vld [vmem:[#allocation5 + $0x58] sm:$0xf0] }
  0xd7   :  { %1970 = vmatpush.bf16.msrb.mxu2 %v3605_v63  ;;  %v3161_v63 = vor.u32 %v4240_v56, %v3158_v57  ;;  %v4228_v43 = vld [vmem:[#allocation5 + $0x24c] sm:$0xf]  ;;  %v3110_v44 = vld [vmem:[#allocation5 + $0x258] sm:$0xf0] }
  0xd8   :  { %1983 = vmatpush.bf16.msrb.mxu3 %v3733_v3  ;;  %v1715_v53 = vpop.f32.mrf.mxu2  ;;  %v3289_v3 = vor.u32 %v4272_v58, %v3286_v59  ;;  %v2838_v55 = vld [vmem:[#allocation5 + $0x38] sm:$0xf0]  ;;  %v4192_v56 = vld [vmem:[#allocation5 + $0x12c] sm:$0xf] }
  0xd9   :  { %1945 = vmatpush.bf16.msrb.mxu0 %v3333_v12  ;;  %v1728_v61 = vpop.f32.mrf.mxu3  ;;  %v3145_v12 = vor.u32 %v4236_v5, %v3142_v6  ;;  %v3113_v53 = vor.u32 %v4228_v43, %v3110_v44  ;;  %v2966_v59 = vld [vmem:[#allocation5 + $0x138] sm:$0xf0]  ;;  %v4156_v1 = vld [vmem:[#allocation5 + $0xc] sm:$0xf] }
  0xda   :  { %1958 = vmatpush.bf16.msrb.mxu1 %v3461_v17  ;;  %v3094_v61 = vld [vmem:[#allocation5 + $0x238] sm:$0xf0]  ;;  %v4188_v5 = vld [vmem:[#allocation5 + $0x10c] sm:$0xf] }
  0xdb   :  { %1971 = vmatpush.bf16.msrb.mxu2 %v3589_v18  ;;  %v3273_v18 = vor.u32 %v4268_v7, %v3270_v8  ;;  %v2822_v2 = vld [vmem:[#allocation5 + $0x18] sm:$0xf0]  ;;  %v4220_v7 = vld [vmem:[#allocation5 + $0x20c] sm:$0xf] }
  0xdc   :  { %1984 = vmatpush.bf16.msrb.mxu3 %v3717_v21  ;;  %1946 = vmatmul.bf16.vlgmr.msrb.gmra.mxu0 %v4742_v39  ;;  %v1739_v10 = vpop.f32.mrf.mxu0  ;;  %v3126_v21 = vld [vmem:[#allocation5 + $0x278] sm:$0xf0]  ;;  %v4376_v19 = vld [vmem:[#allocation5 + $0x6ec] sm:$0xf] }
  0xdd   :  { %1990 = vmatpush.bf16.msra.mxu0 %v2937_v22  ;;  %1959 = vmatmul.bf16.vlgmr.msrb.gmra.mxu1 %v4746_v42  ;;  %v1740_v16 = vadd.f32 %v1739_v10, %v1727_v34  ;;  %v1752_v17 = vpop.f32.mrf.mxu1  ;;  %v4264_v22 = vld [vmem:[#allocation5 + $0x36c] sm:$0xf]  ;;  %v3129_v29 = vor.u32 %v4232_v20, %v3126_v21  ;;  %v2950_v6 = vld [vmem:[#allocation5 + $0x118] sm:$0xf0] }
  0xde   :  { %2003 = vmatpush.bf16.msra.mxu1 %v3065_v24  ;;  %1972 = vmatmul.bf16.vlgmr.msrb.gmra.mxu2 %v4740_v36  ;;  %v3257_v34 = vor.u32 %v4264_v22, %v3254_v23  ;;  %v3078_v10 = vld [vmem:[#allocation5 + $0x218] sm:$0xf0]  ;;  %v2953_v21 = vor.u32 %v4188_v5, %v2950_v6  ;;  %v4408_v23 = vld [vmem:[#allocation5 + $0x7ec] sm:$0xf] }
  0xdf   :  { %2016 = vmatpush.bf16.msra.mxu2 %v3193_v27  ;;  %1985 = vmatmul.bf16.vlgmr.msrb.gmra.mxu3 %v4744_v40  ;;  %v1753_v24 = vadd.f32 %v1752_v17, %v1740_v16  ;;  %v2873_v27 = vor.u32 %v4168_v13, %v2870_v14  ;;  %v4312_v14 = vld [vmem:[#allocation5 + $0x4ec] sm:$0xf]  ;;  %v3446_v15 = vld [vmem:[#allocation5 + $0x4f8] sm:$0xf0]  ;;  %v2825_v17 = vor.u32 %v4156_v1, %v2822_v2 }
  0xe0   :  { %2029 = vmatpush.bf16.msra.mxu3 %v3321_v37  ;;  %v4196_v37 = vld [vmem:[#allocation5 + $0x14c] sm:$0xf]  ;;  %v3702_v20 = vld [vmem:[#allocation5 + $0x6f8] sm:$0xf0]  ;;  %v3081_v22 = vor.u32 %v4220_v7, %v3078_v10 }
  0xe1   :  { %1991 = vmatpush.bf16.msra.mxu0 %v2921_v47  ;;  %v1765_v38 = vpop.f32.mrf.mxu2  ;;  %v4260_v47 = vld [vmem:[#allocation5 + $0x34c] sm:$0xf]  ;;  %v2985_v52 = vor.u32 %v4196_v37, %v2982_v41  ;;  %v3430_v37 = vld [vmem:[#allocation5 + $0x4d8] sm:$0xf0] }
  0xe2   :  { %2004 = vmatpush.bf16.msra.mxu1 %v3049_v48  ;;  %v1766_v45 = vadd.f32 %v1765_v38, %v1753_v24  ;;  %v3238_v48 = vld [vmem:[#allocation5 + $0x358] sm:$0xf0]  ;;  %v4344_v16 = vld [vmem:[#allocation5 + $0x5ec] sm:$0xf] }
  0xe3   :  { %2017 = vmatpush.bf16.msra.mxu2 %v3177_v49  ;;  %v2857_v49 = vor.u32 %v4164_v33, %v2854_v35  ;;  %v3241_v58 = vor.u32 %v4260_v47, %v3238_v48  ;;  %v3830_v24 = vld [vmem:[#allocation5 + $0x7f8] sm:$0xf0]  ;;  %v3705_v33 = vor.u32 %v4376_v19, %v3702_v20  ;;  %v4308_v35 = vld [vmem:[#allocation5 + $0x4cc] sm:$0xf] }
  0xe4   :  { %2030 = vmatpush.bf16.msra.mxu3 %v3305_v54  ;;  %v1778_v46 = vpop.f32.mrf.mxu3  ;;  %v1741_v51 = vpop.f32.mrf.mxu0  ;;  %v4160_v54 = vld [vmem:[#allocation5 + $0x2c] sm:$0xf]  ;;  %v3558_v41 = vld [vmem:[#allocation5 + $0x5d8] sm:$0xf0]  ;;  %v3433_v47 = vor.u32 %v4308_v35, %v3430_v37 }
  0xe5   :  { %1992 = vmatpush.bf16.msra.mxu0 %v2905_v60  ;;  %v4771_v50 = vadd.f32 %v1778_v46, %v1766_v45  ;;  %v1754_v57 = vpop.f32.mrf.mxu1  ;;  %v4224_v60 = vld [vmem:[#allocation5 + $0x22c] sm:$0xf]  ;;  %v2841_v0 = vor.u32 %v4160_v54, %v2838_v55  ;;  %v3686_v44 = vld [vmem:[#allocation5 + $0x6d8] sm:$0xf0] }
  0xe6   :  { %2005 = vmatpush.bf16.msra.mxu1 %v3033_v62  ;;  %v4256_v62 = vld [vmem:[#allocation5 + $0x32c] sm:$0xf]  ;;  %v3097_v4 = vor.u32 %v4224_v60, %v3094_v61  ;;  %v3814_v46 = vld [vmem:[#allocation5 + $0x7d8] sm:$0xf0] }
  0xe7   :  { %2018 = vmatpush.bf16.msra.mxu2 %v3161_v63  ;;  %v3222_v63 = vld [vmem:[#allocation5 + $0x338] sm:$0xf0]  ;;  %v4340_v38 = vld [vmem:[#allocation5 + $0x5cc] sm:$0xf]  ;;  %vm2094_vm1 = vcmp.gt.f32.partialorder %v4771_v50, 0.0 }
  0xe8   :  { %2031 = vmatpush.bf16.msra.mxu3 %v3289_v3  ;;  %v2969_v3 = vor.u32 %v4192_v56, %v2966_v59  ;;  %v4372_v43 = vld [vmem:[#allocation5 + $0x6cc] sm:$0xf]  ;;  %v3561_v48 = vor.u32 %v4340_v38, %v3558_v41  ;;  %v3542_v55 = vld [vmem:[#allocation5 + $0x5b8] sm:$0xf0] }
  0xe9   :  { %1993 = vmatpush.bf16.msra.mxu0 %v2889_v9  ;;  %v1767_v8 = vpop.f32.mrf.mxu2  ;;  %v3225_v9 = vor.u32 %v4256_v62, %v3222_v63  ;;  %v4404_v45 = vld [vmem:[#allocation5 + $0x7cc] sm:$0xf]  ;;  %v3670_v57 = vld [vmem:[#allocation5 + $0x6b8] sm:$0xf0] }
  0xea   :  { %2006 = vmatpush.bf16.msra.mxu1 %v3017_v11  ;;  %v4252_v11 = vld [vmem:[#allocation5 + $0x30c] sm:$0xf]  ;;  %v3817_v54 = vor.u32 %v4404_v45, %v3814_v46  ;;  %v3798_v59 = vld [vmem:[#allocation5 + $0x7b8] sm:$0xf0] }
  0xeb   :  { %2019 = vmatpush.bf16.msra.mxu2 %v3145_v12  ;;  %v3206_v12 = vld [vmem:[#allocation5 + $0x318] sm:$0xf0]  ;;  %v4304_v51 = vld [vmem:[#allocation5 + $0x4ac] sm:$0xf] }
  0xec   :  { %2032 = vmatpush.bf16.msra.mxu3 %v3273_v18  ;;  %v1780_v13 = vpop.f32.mrf.mxu3  ;;  %v3574_v18 = vld [vmem:[#allocation5 + $0x5f8] sm:$0xf0]  ;;  %v4368_v56 = vld [vmem:[#allocation5 + $0x6ac] sm:$0xf] }
  0xed   :  { %1994 = vmatpush.bf16.msra.mxu0 %v2873_v27  ;;  %v3209_v27 = vor.u32 %v4252_v11, %v3206_v12  ;;  %v3673_v62 = vor.u32 %v4368_v56, %v3670_v57  ;;  %v4300_v63 = vld [vmem:[#allocation5 + $0x48c] sm:$0xf]  ;;  %v3526_v2 = vld [vmem:[#allocation5 + $0x598] sm:$0xf0]  ;;  %v391_v56 = vperm.slane %v4764_v30, 1 }
  0xee   :  { %2007 = vmatpush.bf16.msra.mxu1 %v3001_v28  ;;  %v3449_v28 = vor.u32 %v4312_v14, %v3446_v15  ;;  %v4396_v5 = vld [vmem:[#allocation5 + $0x78c] sm:$0xf]  ;;  %v3510_v13 = vld [vmem:[#allocation5 + $0x578] sm:$0xf0] }
  0xef   :  { %2020 = vmatpush.bf16.msra.mxu2 %v3129_v29  ;;  %v3577_v29 = vor.u32 %v4344_v16, %v3574_v18  ;;  %v4296_v8 = vld [vmem:[#allocation5 + $0x46c] sm:$0xf]  ;;  %v3638_v15 = vld [vmem:[#allocation5 + $0x678] sm:$0xf0] }
  0xf0   :  { %2033 = vmatpush.bf16.msra.mxu3 %v3257_v34  ;;  %v3833_v34 = vor.u32 %v4408_v23, %v3830_v24  ;;  %v4328_v10 = vld [vmem:[#allocation5 + $0x56c] sm:$0xf]  ;;  %v3750_v38 = vld [vmem:[#allocation5 + $0x758] sm:$0xf0] }
  0xf1   :  { %1995 = vmatpush.bf16.msra.mxu0 %v2857_v49  ;;  %v3689_v49 = vor.u32 %v4372_v43, %v3686_v44  ;;  %v4360_v14 = vld [vmem:[#allocation5 + $0x66c] sm:$0xf]  ;;  %v3513_v19 = vor.u32 %v4328_v10, %v3510_v13  ;;  %v3350_v46 = vld [vmem:[#allocation5 + $0x438] sm:$0xf0] }
  0xf2   :  { %2008 = vmatpush.bf16.msra.mxu1 %v2985_v52  ;;  %v3414_v52 = vld [vmem:[#allocation5 + $0x4b8] sm:$0xf0]  ;;  %v4392_v16 = vld [vmem:[#allocation5 + $0x76c] sm:$0xf]  ;;  %v3641_v20 = vor.u32 %v4360_v14, %v3638_v15 }
  0xf3   :  { %2021 = vmatpush.bf16.msra.mxu2 %v3113_v53  ;;  %v4336_v53 = vld [vmem:[#allocation5 + $0x5ac] sm:$0xf]  ;;  %v3417_v60 = vor.u32 %v4304_v51, %v3414_v52  ;;  %v3478_v51 = vld [vmem:[#allocation5 + $0x538] sm:$0xf0] }
  0xf4   :  { %2034 = vmatpush.bf16.msra.mxu3 %v3241_v58  ;;  %v4400_v58 = vld [vmem:[#allocation5 + $0x7ac] sm:$0xf]  ;;  %v3545_v61 = vor.u32 %v4336_v53, %v3542_v55  ;;  %v3606_v53 = vld [vmem:[#allocation5 + $0x638] sm:$0xf0] }
  0xf5   :  { %1996 = vmatpush.bf16.msra.mxu0 %v2841_v0  ;;  %v3398_v0 = vld [vmem:[#allocation5 + $0x498] sm:$0xf0]  ;;  %v3801_v1 = vor.u32 %v4400_v58, %v3798_v59  ;;  %v4324_v23 = vld [vmem:[#allocation5 + $0x54c] sm:$0xf] }
  0xf6   :  { %2009 = vmatpush.bf16.msra.mxu1 %v2969_v3  ;;  %v4364_v3 = vld [vmem:[#allocation5 + $0x68c] sm:$0xf]  ;;  %v3734_v55 = vld [vmem:[#allocation5 + $0x738] sm:$0xf0] }
  0xf7   :  { %2022 = vmatpush.bf16.msra.mxu2 %v3097_v4  ;;  %v3654_v4 = vld [vmem:[#allocation5 + $0x698] sm:$0xf0]  ;;  %v4388_v37 = vld [vmem:[#allocation5 + $0x74c] sm:$0xf] }
  0xf8   :  { %2035 = vmatpush.bf16.msra.mxu3 %v3225_v9  ;;  %v3657_v7 = vor.u32 %v4364_v3, %v3654_v4  ;;  %v3382_v9 = vld [vmem:[#allocation5 + $0x478] sm:$0xf0]  ;;  %v4288_v45 = vld [vmem:[#allocation5 + $0x42c] sm:$0xf] }
  0xf9   :  { %1997 = vmatpush.bf16.msra.mxu0 %v2825_v17  ;;  %v4777_v6 = vpop.f32.mrf.mxu0  ;;  %v3766_v17 = vld [vmem:[#allocation5 + $0x778] sm:$0xf0]  ;;  %v3385_v18 = vor.u32 %v4296_v8, %v3382_v9  ;;  %v4352_v52 = vld [vmem:[#allocation5 + $0x62c] sm:$0xf]  ;;  %v3353_v57 = vor.u32 %v4288_v45, %v3350_v46  ;;  %v3860_v45 = vld [vmem:[#allocation8 + $0x30] sm:$0xf] }
  0xfa   :  { %2010 = vmatpush.bf16.msra.mxu1 %v2953_v21  ;;  %v4779_v11 = vpop.f32.mrf.mxu1  ;;  %v4292_v21 = vld [vmem:[#allocation5 + $0x44c] sm:$0xf]  ;;  %v4426_v30 = vld [vmem:[#allocation8 + $0x74] sm:$0xf0]  ;;  %v3924_v46 = vld [vmem:[#allocation8 + $0xb0] sm:$0xf] }
  0xfb   :  { %2023 = vmatpush.bf16.msra.mxu2 %v3081_v22  ;;  %v3366_v22 = vld [vmem:[#allocation5 + $0x458] sm:$0xf0]  ;;  %v4284_v58 = vld [vmem:[#allocation5 + $0x40c] sm:$0xf] }
  0xfc   :  { %2036 = vmatpush.bf16.msra.mxu3 %v3209_v27  ;;  %1998 = vmatmul.bf16.vlgmr.msra.gmra.mxu0 %v4730_v26  ;;  %v3782_v26 = vld [vmem:[#allocation5 + $0x798] sm:$0xf0]  ;;  %v3769_v27 = vor.u32 %v4392_v16, %v3766_v17  ;;  %v4380_v3 = vld [vmem:[#allocation5 + $0x70c] sm:$0xf]  ;;  %v3884_v16 = vld [vmem:[#allocation8 + $0x60] sm:$0xf] }
  0xfd   :  { %2042 = vmatpush.bf16.msrb.mxu0 %v3449_v28  ;;  %2011 = vmatmul.bf16.vlgmr.msra.gmra.mxu1 %v4734_v32  ;;  %v3785_v12 = vor.u32 %v4396_v5, %v3782_v26  ;;  %v3494_v28 = vld [vmem:[#allocation5 + $0x558] sm:$0xf0]  ;;  %v3892_v26 = vld [vmem:[#allocation8 + $0x70] sm:$0xf]  ;;  %v4424_v17 = vld [vmem:[#allocation8 + $0x64] sm:$0xf0] }
  0xfe   :  { %2055 = vmatpush.bf16.msrb.mxu1 %v3577_v29  ;;  %2024 = vmatmul.bf16.vlgmr.msra.gmra.mxu2 %v4728_v25  ;;  %v4332_v25 = vld [vmem:[#allocation5 + $0x58c] sm:$0xf]  ;;  %v3497_v43 = vor.u32 %v4324_v23, %v3494_v28  ;;  %v3718_v5 = vld [vmem:[#allocation5 + $0x718] sm:$0xf0]  ;;  %v3893_v13 = vor.u32 %v4426_v30, %v3892_v26 }
  0xff   :  { %2068 = vmatpush.bf16.msrb.mxu2 %v3705_v33  ;;  %2037 = vmatmul.bf16.vlgmr.msra.gmra.mxu3 %v4732_v31  ;;  %v3401_v31 = vor.u32 %v4300_v63, %v3398_v0  ;;  %v3529_v32 = vor.u32 %v4332_v25, %v3526_v2  ;;  %v4356_v29 = vld [vmem:[#allocation5 + $0x64c] sm:$0xf]  ;;  %v3622_v33 = vld [vmem:[#allocation5 + $0x658] sm:$0xf0] }
 0x100   :  { %2081 = vmatpush.bf16.msrb.mxu3 %v3833_v34  ;;  %v3369_v34 = vor.u32 %v4292_v21, %v3366_v22  ;;  %v3625_v44 = vor.u32 %v4356_v29, %v3622_v33  ;;  %v3462_v63 = vld [vmem:[#allocation5 + $0x518] sm:$0xf0]  ;;  %v3876_v22 = vld [vmem:[#allocation8 + $0x50] sm:$0xf] }
 0x101   :  { %2043 = vmatpush.bf16.msrb.mxu0 %v3433_v47  ;;  %v4781_v24 = vpop.f32.mrf.mxu2  ;;  %v1793_v41 = vpop.f32.mrf.mxu0  ;;  %v4320_v47 = vld [vmem:[#allocation5 + $0x52c] sm:$0xf]  ;;  %v3590_v2 = vld [vmem:[#allocation5 + $0x618] sm:$0xf0] }
 0x102   :  { %2056 = vmatpush.bf16.msrb.mxu1 %v3561_v48  ;;  %v4783_v35 = vpop.f32.mrf.mxu3  ;;  %v1806_v48 = vpop.f32.mrf.mxu1  ;;  %v3481_v59 = vor.u32 %v4320_v47, %v3478_v51  ;;  %v4442_v8 = vld [vmem:[#allocation8 + $0xf4] sm:$0xf0]  ;;  %v4456_v51 = vld [vmem:[#allocation8 + $0x164] sm:$0xf0] }
 0x103   :  { %2069 = vmatpush.bf16.msrb.mxu2 %v3689_v49  ;;  %v3753_v49 = vor.u32 %v4388_v37, %v3750_v38  ;;  %v4422_v23 = vld [vmem:[#allocation8 + $0x54] sm:$0xf0]  ;;  %v4420_v37 = vld [vmem:[#allocation8 + $0x44] sm:$0xf0]  ;;  %v3932_v38 = vld [vmem:[#allocation8 + $0xc0] sm:$0xf] }
 0x104   :  { %2082 = vmatpush.bf16.msrb.mxu3 %v3817_v54  ;;  %v4384_v54 = vld [vmem:[#allocation5 + $0x72c] sm:$0xf]  ;;  %v3877_v28 = vor.u32 %v4422_v23, %v3876_v22  ;;  %v4458_v41 = vld [vmem:[#allocation8 + $0x174] sm:$0xf0]  ;;  %v3988_v22 = vld [vmem:[#allocation8 + $0x130] sm:$0xf] }
 0x105   :  { %2044 = vmatpush.bf16.msrb.mxu0 %v3417_v60  ;;  %v3609_v60 = vor.u32 %v4352_v52, %v3606_v53  ;;  %v3737_v25 = vor.u32 %v4384_v54, %v3734_v55  ;;  %v4414_v26 = vld [vmem:[#allocation8 + $0x14] sm:$0xf0] }
 0x106   :  { %2057 = vmatpush.bf16.msrb.mxu1 %v3545_v61  ;;  %v3334_v61 = vld [vmem:[#allocation5 + $0x418] sm:$0xf0] }
 0x107   :  { %2070 = vmatpush.bf16.msrb.mxu2 %v3673_v62  ;;  %v4316_v62 = vld [vmem:[#allocation5 + $0x50c] sm:$0xf]  ;;  %v4450_v23 = vld [vmem:[#allocation8 + $0x134] sm:$0xf0] }
 0x108   :  { %2083 = vmatpush.bf16.msrb.mxu3 %v3801_v1  ;;  %v4348_v1 = vld [vmem:[#allocation5 + $0x60c] sm:$0xf]  ;;  %v3465_v9 = vor.u32 %v4316_v62, %v3462_v63  ;;  %v4004_v63 = vld [vmem:[#allocation8 + $0x150] sm:$0xf] }
 0x109   :  { %2045 = vmatpush.bf16.msrb.mxu0 %v3401_v31  ;;  %v1819_v0 = vpop.f32.mrf.mxu2  ;;  %v1792_v31 = vadd.f32 %v4777_v6, %v391_v56  ;;  %v3593_v10 = vor.u32 %v4348_v1, %v3590_v2  ;;  %v3885_v6 = vor.u32 %v4424_v17, %v3884_v16  ;;  %v3852_v56 = vld [vmem:[#allocation8 + $0x20] sm:$0xf] }
 0x10a   :  { %2058 = vmatpush.bf16.msrb.mxu1 %v3529_v32  ;;  %v1832_v4 = vpop.f32.mrf.mxu3  ;;  %v3337_v32 = vor.u32 %v4284_v58, %v3334_v61  ;;  %v3916_v58 = vld [vmem:[#allocation8 + $0xa0] sm:$0xf]  ;;  %v4454_v0 = vld [vmem:[#allocation8 + $0x154] sm:$0xf0] }
 0x10b   :  { %2071 = vmatpush.bf16.msrb.mxu2 %v3657_v7  ;;  %v3956_v7 = vld [vmem:[#allocation8 + $0xf0] sm:$0xf]  ;;  %v1805_v15 = vadd.f32 %v4779_v11, %v1792_v31 }
 0x10c   :  { %2084 = vmatpush.bf16.msrb.mxu3 %v3785_v12  ;;  %v3721_v12 = vor.u32 %v4380_v3, %v3718_v5  ;;  %v3957_v14 = vor.u32 %v4442_v8, %v3956_v7  ;;  %v3940_v11 = vld [vmem:[#allocation8 + $0xd0] sm:$0xf]  ;;  %v3996_v7 = vld [vmem:[#allocation8 + $0x140] sm:$0xf]  ;;  %v2098_v8 = vmul.f32 0.2, %v4771_v50 }
 0x10d   :  { %2046 = vmatpush.bf16.msrb.mxu0 %v3385_v18  ;;  %v3948_v18 = vld [vmem:[#allocation8 + $0xe0] sm:$0xf]  ;;  %v1818_v21 = vadd.f32 %v4781_v24, %v1805_v15  ;;  %v4436_v24 = vld [vmem:[#allocation8 + $0xc4] sm:$0xf0]  ;;  %v3844_v5 = vld [vmem:[#allocation8 + $0x10] sm:$0xf] }
 0x10e   :  { %2059 = vmatpush.bf16.msrb.mxu1 %v3513_v19  ;;  %v4440_v19 = vld [vmem:[#allocation8 + $0xe4] sm:$0xf0]  ;;  %v3908_v31 = vld [vmem:[#allocation8 + $0x90] sm:$0xf] }
 0x10f   :  { %2072 = vmatpush.bf16.msrb.mxu2 %v3641_v20  ;;  %v3949_v20 = vor.u32 %v4440_v19, %v3948_v18  ;;  %v1831_v29 = vadd.f32 %v4783_v35, %v1818_v21  ;;  %v4434_v35 = vld [vmem:[#allocation8 + $0xb4] sm:$0xf0]  ;;  %v4428_v15 = vld [vmem:[#allocation8 + $0x84] sm:$0xf0]  ;;  %v4425_v19 = vld [vmem:[#allocation8 + $0x74] sm:$0xf] }
 0x110   :  { %2085 = vmatpush.bf16.msrb.mxu3 %v3769_v27  ;;  %v4438_v27 = vld [vmem:[#allocation8 + $0xd4] sm:$0xf0]  ;;  %v3925_v55 = vor.u32 %v4434_v35, %v3924_v46 }
 0x111   :  { %2047 = vmatpush.bf16.msrb.mxu0 %v3369_v34  ;;  %v3941_v33 = vor.u32 %v4438_v27, %v3940_v11  ;;  %v4020_v34 = vld [vmem:[#allocation8 + $0x170] sm:$0xf]  ;;  %v4441_v11 = vld [vmem:[#allocation8 + $0xf4] sm:$0xf]  ;;  %v3958_v27 = vld [vmem:[#allocation8 + $0xf8] sm:$0xf0] }
 0x112   :  { %2060 = vmatpush.bf16.msrb.mxu1 %v3497_v43  ;;  %v4021_v43 = vor.u32 %v4458_v41, %v4020_v34  ;;  %v4423_v34 = vld [vmem:[#allocation8 + $0x64] sm:$0xf]  ;;  %v3886_v41 = vld [vmem:[#allocation8 + $0x68] sm:$0xf0]  ;;  %v4446_v35 = vld [vmem:[#allocation8 + $0x114] sm:$0xf0] }
 0x113   :  { %2073 = vmatpush.bf16.msrb.mxu2 %v3625_v44  ;;  %v3933_v44 = vor.u32 %v4436_v24, %v3932_v38  ;;  %v2102_v38 = vsel %vm2094_vm1, %v4771_v50, %v2098_v8  ;;  %v3961_v24 = vor.u32 %v4441_v11, %v3958_v27  ;;  %v4014_v8 = vld [vmem:[#allocation8 + $0x168] sm:$0xf0]  ;;  %v3846_v11 = vld [vmem:[#allocation8 + $0x18] sm:$0xf0] }
 0x114   :  { %2086 = vmatpush.bf16.msrb.mxu3 %v3753_v49  ;;  %v4012_v49 = vld [vmem:[#allocation8 + $0x160] sm:$0xf]  ;;  %v4799_v46 = vpack.c.bf16 %v2102_v38, %v2102_v38 }
 0x115   :  { %2048 = vmatpush.bf16.msrb.mxu0 %v3353_v57  ;;  %v4013_v53 = vor.u32 %v4456_v51, %v4012_v49  ;;  %v4416_v57 = vld [vmem:[#allocation8 + $0x24] sm:$0xf0]  ;;  %v4421_v49 = vld [vmem:[#allocation8 + $0x54] sm:$0xf]  ;;  %v3878_v51 = vld [vmem:[#allocation8 + $0x58] sm:$0xf0] }
 0x116   :  { %2061 = vmatpush.bf16.msrb.mxu1 %v3481_v59  ;;  %v3853_v1 = vor.u32 %v4416_v57, %v3852_v56  ;;  %v4444_v56 = vld [vmem:[#allocation8 + $0x104] sm:$0xf0]  ;;  %v4457_v57 = vld [vmem:[#allocation8 + $0x174] sm:$0xf] }
 0x117   :  { %2074 = vmatpush.bf16.msrb.mxu2 %v3609_v60  ;;  %v4432_v60 = vld [vmem:[#allocation8 + $0xa4] sm:$0xf0] }
 0x118   :  { %2087 = vmatpush.bf16.msrb.mxu3 %v3737_v25  ;;  %v4005_v25 = vor.u32 %v4454_v0, %v4004_v63  ;;  %v3917_v3 = vor.u32 %v4432_v60, %v3916_v58  ;;  %v4022_v58 = vld [vmem:[#allocation8 + $0x178] sm:$0xf0]  ;;  %v4435_v0 = vld [vmem:[#allocation8 + $0xc4] sm:$0xf] }
 0x119   :  { %2049 = vmatpush.bf16.msrb.mxu0 %v3337_v32  ;;  %v4430_v32 = vld [vmem:[#allocation8 + $0x94] sm:$0xf0] }
 0x11a   :  { %2062 = vmatpush.bf16.msrb.mxu1 %v3465_v9  ;;  %v1856_v48 = vpop.f32.mrf.mxu1  ;;  %v3836_v9 = vld [vmem:[#allocation8] sm:$0xf]  ;;  %v3909_v18 = vor.u32 %v4430_v32, %v3908_v31  ;;  %v3926_v31 = vld [vmem:[#allocation8 + $0xb8] sm:$0xf0] }
 0x11b   :  { %2075 = vmatpush.bf16.msrb.mxu2 %v3593_v10  ;;  %v4452_v10 = vld [vmem:[#allocation8 + $0x144] sm:$0xf0] }
 0x11c   :  { %2088 = vmatpush.bf16.msrb.mxu3 %v3721_v12  ;;  %2050 = vmatmul.bf16.vlgmr.msrb.gmra.mxu0 %v4742_v39  ;;  %v3868_v39 = vld [vmem:[#allocation8 + $0x40] sm:$0xf]  ;;  %v3845_v12 = vor.u32 %v4414_v26, %v3844_v5  ;;  %v3997_v16 = vor.u32 %v4452_v10, %v3996_v7  ;;  %v3862_v5 = vld [vmem:[#allocation8 + $0x38] sm:$0xf0]  ;;  %v4433_v26 = vld [vmem:[#allocation8 + $0xb4] sm:$0xf] }
 0x11d   :  { %2500 = vmatpush.bf16.msra.mxu0 %v3893_v13  ;;  %2063 = vmatmul.bf16.vlgmr.msrb.gmra.mxu1 %v4746_v42  ;;  %v3869_v42 = vor.u32 %v4420_v37, %v3868_v39  ;;  %v4412_v13 = vld [vmem:[#allocation8 + $0x4] sm:$0xf0]  ;;  %v4455_v7 = vld [vmem:[#allocation8 + $0x164] sm:$0xf] }
 0x11e   :  { %2513 = vmatpush.bf16.msra.mxu1 %v3957_v14  ;;  %2076 = vmatmul.bf16.vlgmr.msrb.gmra.mxu2 %v4740_v36  ;;  %v1843_v36 = vpop.f32.mrf.mxu0  ;;  %v3900_v14 = vld [vmem:[#allocation8 + $0x80] sm:$0xf] }
 0x11f   :  { %2089 = vmatmul.bf16.vlgmr.msrb.gmra.mxu3 %v4744_v40  ;;  %v4418_v40 = vld [vmem:[#allocation8 + $0x34] sm:$0xf0]  ;;  %v1844_v47 = vadd.f32 %v1843_v36, %v1831_v29  ;;  %2526 = vmatpush.bf16.msra.mxu2 %v4021_v43  ;;  %v3837_v29 = vor.u32 %v4412_v13, %v3836_v9  ;;  %v3901_v39 = vor.u32 %v4428_v15, %v3900_v14  ;;  %v4439_v43 = vld [vmem:[#allocation8 + $0xe4] sm:$0xf]  ;;  %v3980_v36 = vld [vmem:[#allocation8 + $0x120] sm:$0xf] }
 0x120   :  { %v3861_v54 = vor.u32 %v4418_v40, %v3860_v45  ;;  %v4017_v9 = vor.u32 %v4455_v7, %v4014_v8  ;;  %v4415_v13 = vld [vmem:[#allocation8 + $0x24] sm:$0xf]  ;;  %v3854_v14 = vld [vmem:[#allocation8 + $0x28] sm:$0xf0]  ;;  %v4068_v7 = vld [vmem:[#allocation8 + $0x1d0] sm:$0xf] }
 0x121   :  { %2501 = vmatpush.bf16.msra.mxu0 %v3885_v6  ;;  %v1857_v52 = vadd.f32 %v1856_v48, %v1844_v47  ;;  %v1869_v59 = vpop.f32.mrf.mxu2  ;;  %v3894_v6 = vld [vmem:[#allocation8 + $0x78] sm:$0xf0]  ;;  %v3889_v47 = vor.u32 %v4423_v34, %v3886_v41  ;;  %v3972_v48 = vld [vmem:[#allocation8 + $0x110] sm:$0xf]  ;;  %v4431_v15 = vld [vmem:[#allocation8 + $0xa4] sm:$0xf] }
 0x122   :  { %2514 = vmatpush.bf16.msra.mxu1 %v3949_v20  ;;  %v1882_v62 = vpop.f32.mrf.mxu3  ;;  %v1858_v30 = vpop.f32.mrf.mxu1  ;;  %v3897_v37 = vor.u32 %v4425_v19, %v3894_v6  ;;  %v4453_v19 = vld [vmem:[#allocation8 + $0x154] sm:$0xf]  ;;  %v4006_v6 = vld [vmem:[#allocation8 + $0x158] sm:$0xf0]  ;;  %v4470_v8 = vld [vmem:[#allocation8 + $0x1d4] sm:$0xf0] }
 0x123   :  { %2527 = vmatpush.bf16.msra.mxu2 %v4013_v53  ;;  %v1870_v61 = vadd.f32 %v1869_v59, %v1857_v52  ;;  %v4437_v52 = vld [vmem:[#allocation8 + $0xd4] sm:$0xf]  ;;  %v3973_v53 = vor.u32 %v4446_v35, %v3972_v48  ;;  %v3881_v59 = vor.u32 %v4421_v49, %v3878_v51  ;;  %v3990_v35 = vld [vmem:[#allocation8 + $0x138] sm:$0xf0]  ;;  %v4447_v51 = vld [vmem:[#allocation8 + $0x124] sm:$0xf] }
 0x124   :  { %v4449_v48 = vld [vmem:[#allocation8 + $0x134] sm:$0xf] }
 0x125   :  { %2502 = vmatpush.bf16.msra.mxu0 %v3877_v28  ;;  %v1883_v4 = vadd.f32 %v1882_v62, %v1870_v61  ;;  %v3989_v28 = vor.u32 %v4450_v23, %v3988_v22  ;;  %v4419_v61 = vld [vmem:[#allocation8 + $0x44] sm:$0xf]  ;;  %v3870_v62 = vld [vmem:[#allocation8 + $0x48] sm:$0xf0]  ;;  %v4413_v23 = vld [vmem:[#allocation8 + $0x14] sm:$0xf]  ;;  %v3993_v49 = vor.u32 %v4449_v48, %v3990_v35 }
 0x126   :  { %2515 = vmatpush.bf16.msra.mxu1 %v3941_v33  ;;  %v1845_v2 = vpop.f32.mrf.mxu0  ;;  %v3849_v38 = vor.u32 %v4413_v23, %v3846_v11  ;;  %v4044_v23 = vld [vmem:[#allocation8 + $0x1a0] sm:$0xf]  ;;  %v4464_v11 = vld [vmem:[#allocation8 + $0x1a4] sm:$0xf0] }
 0x127   :  { %2528 = vmatpush.bf16.msra.mxu2 %v4005_v25  ;;  %v2099_v17 = vmul.f32 0.2, %v1883_v4  ;;  %vm2095_vm0 = vcmp.gt.f32.partialorder %v1883_v4, 0.0  ;;  %v3934_v25 = vld [vmem:[#allocation8 + $0xc8] sm:$0xf0]  ;;  %v3873_v2 = vor.u32 %v4419_v61, %v3870_v62 }
 0x128   :  { %v3974_v61 = vld [vmem:[#allocation8 + $0x118] sm:$0xf0] }
 0x129   :  { %2503 = vmatpush.bf16.msra.mxu0 %v3869_v42  ;;  %v1871_v20 = vpop.f32.mrf.mxu2  ;;  %v2103_v33 = vsel %vm2095_vm0, %v1883_v4, %v2099_v17  ;;  %v3950_v42 = vld [vmem:[#allocation8 + $0xe8] sm:$0xf0]  ;;  %v4417_v4 = vld [vmem:[#allocation8 + $0x34] sm:$0xf] }
 0x12a   :  { %2516 = vmatpush.bf16.msra.mxu1 %v3933_v44  ;;  %v1884_v21 = vpop.f32.mrf.mxu3  ;;  %v4448_v44 = vld [vmem:[#allocation8 + $0x124] sm:$0xf0]  ;;  %v4797_v45 = vpack.c.bf16 %v2103_v33, %v2103_v33  ;;  %v3953_v50 = vor.u32 %v4439_v43, %v3950_v42  ;;  %v3865_v10 = vor.u32 %v4417_v4, %v3862_v5  ;;  %v3857_v20 = vor.u32 %v4415_v13, %v3854_v14  ;;  %v4411_v42 = vld [vmem:[#allocation8 + $0x4] sm:$0xf]  ;;  %v4076_v4 = vld [vmem:[#allocation8 + $0x1e0] sm:$0xf] }
 0x12b   :  { %2529 = vmatpush.bf16.msra.mxu2 %v3997_v16  ;;  %v3981_v40 = vor.u32 %v4448_v44, %v3980_v36  ;;  %v3918_v16 = vld [vmem:[#allocation8 + $0xa8] sm:$0xf0]  ;;  %v4009_v21 = vor.u32 %v4453_v19, %v4006_v6  ;;  %v4427_v44 = vld [vmem:[#allocation8 + $0x84] sm:$0xf]  ;;  %v4472_v5 = vld [vmem:[#allocation8 + $0x1e4] sm:$0xf0] }
 0x12c   :  { %v3921_v22 = vor.u32 %v4431_v15, %v3918_v16  ;;  %v3838_v36 = vld [vmem:[#allocation8 + $0x8] sm:$0xf0]  ;;  %v4468_v14 = vld [vmem:[#allocation8 + $0x1c4] sm:$0xf0]  ;;  %v4052_v16 = vld [vmem:[#allocation8 + $0x1b0] sm:$0xf] }
 0x12d   :  { %2504 = vmatpush.bf16.msra.mxu0 %v3861_v54  ;;  %v3942_v54 = vld [vmem:[#allocation8 + $0xd8] sm:$0xf0] }
 0x12e   :  { %2517 = vmatpush.bf16.msra.mxu1 %v3925_v55  ;;  %v3964_v55 = vld [vmem:[#allocation8 + $0x100] sm:$0xf]  ;;  %v3945_v60 = vor.u32 %v4437_v52, %v3942_v54  ;;  %v3982_v52 = vld [vmem:[#allocation8 + $0x128] sm:$0xf0]  ;;  %v3841_v54 = vor.u32 %v4411_v42, %v3838_v36  ;;  %v4473_v42 = vld [vmem:[#allocation8 + $0x1f4] sm:$0xf] }
 0x12f   :  { %2530 = vmatpush.bf16.msra.mxu2 %v3989_v28  ;;  %v3965_v63 = vor.u32 %v4444_v56, %v3964_v55  ;;  %v4429_v28 = vld [vmem:[#allocation8 + $0x94] sm:$0xf]  ;;  %v4084_v55 = vld [vmem:[#allocation8 + $0x1f0] sm:$0xf]  ;;  %v4086_v36 = vld [vmem:[#allocation8 + $0x1f8] sm:$0xf0] }
 0x131   :  { %2505 = vmatpush.bf16.msra.mxu0 %v3853_v1  ;;  %v4025_v1 = vor.u32 %v4457_v57, %v4022_v58  ;;  %v4474_v57 = vld [vmem:[#allocation8 + $0x1f4] sm:$0xf0]  ;;  %v3985_v58 = vor.u32 %v4447_v51, %v3982_v52  ;;  %v4070_v51 = vld [vmem:[#allocation8 + $0x1d8] sm:$0xf0] }
 0x132   :  { %2518 = vmatpush.bf16.msra.mxu1 %v3917_v3  ;;  %v3937_v3 = vor.u32 %v4435_v0, %v3934_v25  ;;  %v4443_v0 = vld [vmem:[#allocation8 + $0x104] sm:$0xf]  ;;  %v3966_v25 = vld [vmem:[#allocation8 + $0x108] sm:$0xf0] }
 0x133   :  { %2531 = vmatpush.bf16.msra.mxu2 %v3981_v40  ;;  %v3902_v40 = vld [vmem:[#allocation8 + $0x88] sm:$0xf0] }
 0x134   :  { %v3905_v56 = vor.u32 %v4427_v44, %v3902_v40  ;;  %v4089_v44 = vor.u32 %v4473_v42, %v4086_v36  ;;  %v4471_v40 = vld [vmem:[#allocation8 + $0x1e4] sm:$0xf] }
 0x135   :  { %2506 = vmatpush.bf16.msra.mxu0 %v3845_v12  ;;  %v3929_v12 = vor.u32 %v4433_v26, %v3926_v31 }
 0x136   :  { %2519 = vmatpush.bf16.msra.mxu1 %v3909_v18 }
 0x137   :  { %2532 = vmatpush.bf16.msra.mxu2 %v3973_v53 }
 0x139   :  { %2507 = vmatpush.bf16.msra.mxu0 %v3837_v29  ;;  %v1895_v30 = vpop.f32.mrf.mxu0  ;;  %v3910_v29 = vld [vmem:[#allocation8 + $0x98] sm:$0xf0] }
 0x13a   :  { %2520 = vmatpush.bf16.msra.mxu1 %v3901_v39  ;;  %v4803_v32 = vpop.f32.mrf.mxu1  ;;  %v4451_v39 = vld [vmem:[#allocation8 + $0x144] sm:$0xf]  ;;  %v3913_v43 = vor.u32 %v4429_v28, %v3910_v29 }
 0x13b   :  { %2533 = vmatpush.bf16.msra.mxu2 %v3965_v63 }
 0x13c   :  { %2508 = vmatmul.bf16.vlgmr.msra.gmra.mxu0 %v4799_v46 }
 0x13d   :  { %2552 = vmatpush.bf16.msrb.mxu0 %v3897_v37  ;;  %2521 = vmatmul.bf16.vlgmr.msra.gmra.mxu1 %v4797_v45  ;;  %v3998_v37 = vld [vmem:[#allocation8 + $0x148] sm:$0xf0] }
 0x13e   :  { %2565 = vmatpush.bf16.msrb.mxu1 %v3961_v24  ;;  %v4805_v24 = vld [vmem:[#allocation7] sm:$0xf]  ;;  %v4001_v41 = vor.u32 %v4451_v39, %v3998_v37  ;;  %v4036_v39 = vld [vmem:[#allocation8 + $0x190] sm:$0xf]  ;;  %v4462_v37 = vld [vmem:[#allocation8 + $0x194] sm:$0xf0] }
 0x13f   :  { %2578 = vmatpush.bf16.msrb.mxu2 %v4025_v1  ;;  %v392_v34 = vperm.slane %v4805_v24, 2 }
 0x141   :  { %2553 = vmatpush.bf16.msrb.mxu0 %v3889_v47  ;;  %v1921_v17 = vpop.f32.mrf.mxu2  ;;  %v1897_v27 = vpop.f32.mrf.mxu0  ;;  %v1896_v53 = vadd.f32 %v1895_v30, %v392_v34  ;;  %v4077_v30 = vor.u32 %v4472_v5, %v4076_v4  ;;  %v4028_v34 = vld [vmem:[#allocation8 + $0x180] sm:$0xf]  ;;  %v4461_v5 = vld [vmem:[#allocation8 + $0x194] sm:$0xf] }
 0x142   :  { %2566 = vmatpush.bf16.msrb.mxu1 %v3953_v50  ;;  %v1934_v18 = vpop.f32.mrf.mxu3  ;;  %v1910_v33 = vpop.f32.mrf.mxu1 }
 0x143   :  { %2579 = vmatpush.bf16.msrb.mxu2 %v4017_v9  ;;  %v1909_v62 = vadd.f32 %v4803_v32, %v1896_v53  ;;  %v4069_v9 = vor.u32 %v4470_v8, %v4068_v7  ;;  %v4045_v33 = vor.u32 %v4464_v11, %v4044_v23  ;;  %v4459_v7 = vld [vmem:[#allocation8 + $0x184] sm:$0xf]  ;;  %v4030_v8 = vld [vmem:[#allocation8 + $0x188] sm:$0xf0] }
 0x144   :  { %v2174_v23 = vld [vmem:[%s4825_s4] sm:$0x3] }
 0x145   :  { %2554 = vmatpush.bf16.msrb.mxu0 %v3881_v59  ;;  %v4085_v59 = vor.u32 %v4474_v57, %v4084_v55  ;;  %v1922_v1 = vadd.f32 %v1921_v17, %v1909_v62  ;;  %v4466_v17 = vld [vmem:[#allocation8 + $0x1b4] sm:$0xf0]  ;;  %v4062_v57 = vld [vmem:[#allocation8 + $0x1c8] sm:$0xf0]  ;;  %v4054_v62 = vld [vmem:[#allocation8 + $0x1b8] sm:$0xf0] }
 0x146   :  { %2567 = vmatpush.bf16.msrb.mxu1 %v3945_v60  ;;  %v4445_v60 = vld [vmem:[#allocation8 + $0x114] sm:$0xf]  ;;  %v2176_v11 = vperm.slane %v2174_v23, 0 }
 0x147   :  { %2580 = vmatpush.bf16.msrb.mxu2 %v4009_v21  ;;  %2539 = vmatpush.bf16.msra.mxu3 %v4085_v59  ;;  %v3977_v63 = vor.u32 %v4445_v60, %v3974_v61  ;;  %v4053_v21 = vor.u32 %v4466_v17, %v4052_v16  ;;  %v393_v60 = vperm.slane %v4805_v24, 3  ;;  %v4465_v61 = vld [vmem:[#allocation8 + $0x1b4] sm:$0xf]  ;;  %v4033_v24 = vor.u32 %v4459_v7, %v4030_v8 }
 0x149   :  { %2555 = vmatpush.bf16.msrb.mxu0 %v3873_v2  ;;  %v1923_v47 = vpop.f32.mrf.mxu2  ;;  %v3969_v2 = vor.u32 %v4443_v0, %v3966_v25  ;;  %v4057_v0 = vor.u32 %v4465_v61, %v4054_v62  ;;  %v4463_v25 = vld [vmem:[#allocation8 + $0x1a4] sm:$0xf]  ;;  %v4486_v61 = vld [vmem:[#allocation10 + $0x58] sm:$0xff]  ;;  %v4485_v62 = vld [vmem:[#allocation10 + $0x50] sm:$0xff] }
 0x14a   :  { %2568 = vmatpush.bf16.msrb.mxu1 %v3937_v3  ;;  %v1936_v50 = vpop.f32.mrf.mxu3  ;;  %v1935_v3 = vadd.f32 %v1934_v18, %v1922_v1  ;;  %v4078_v47 = vld [vmem:[#allocation8 + $0x1e8] sm:$0xf0] }
 0x14b   :  { %2581 = vmatpush.bf16.msrb.mxu2 %v4001_v41  ;;  %2540 = vmatpush.bf16.msra.mxu3 %v4077_v30  ;;  %v4460_v41 = vld [vmem:[#allocation8 + $0x184] sm:$0xf0]  ;;  %v4081_v35 = vor.u32 %v4471_v40, %v4078_v47  ;;  %v4046_v1 = vld [vmem:[#allocation8 + $0x1a8] sm:$0xf0]  ;;  %v4482_v40 = vld [vmem:[#allocation10 + $0x38] sm:$0xff] }
 0x14c   :  { %v4490_v47 = vld [vmem:[#allocation10 + $0x78] sm:$0xff] }
 0x14d   :  { %2556 = vmatpush.bf16.msrb.mxu0 %v3865_v10 }
 0x14e   :  { %2569 = vmatpush.bf16.msrb.mxu1 %v3929_v12 }
 0x14f   :  { %2582 = vmatpush.bf16.msrb.mxu2 %v3993_v49  ;;  %2541 = vmatpush.bf16.msra.mxu3 %v4069_v9  ;;  %v4469_v49 = vld [vmem:[#allocation8 + $0x1d4] sm:$0xf] }
 0x150   :  { %v4073_v53 = vor.u32 %v4469_v49, %v4070_v51  ;;  %v4479_v51 = vld [vmem:[#allocation10 + $0x20] sm:$0xff] }
 0x151   :  { %2557 = vmatpush.bf16.msrb.mxu0 %v3857_v20 }
 0x152   :  { %2570 = vmatpush.bf16.msrb.mxu1 %v3921_v22 }
 0x153   :  { %2583 = vmatpush.bf16.msrb.mxu2 %v3985_v58 }
 0x155   :  { %2558 = vmatpush.bf16.msrb.mxu0 %v3849_v38  ;;  %v4037_v38 = vor.u32 %v4462_v37, %v4036_v39 }
 0x156   :  { %2571 = vmatpush.bf16.msrb.mxu1 %v3913_v43  ;;  %v4029_v43 = vor.u32 %v4460_v41, %v4028_v34 }
 0x157   :  { %2584 = vmatpush.bf16.msrb.mxu2 %v3977_v63 }
 0x159   :  { %2559 = vmatpush.bf16.msrb.mxu0 %v3841_v54  ;;  %v1947_v26 = vpop.f32.mrf.mxu0 }
 0x15a   :  { %2572 = vmatpush.bf16.msrb.mxu1 %v3905_v56  ;;  %v1948_v31 = vadd.f32 %v1947_v26, %v1935_v3  ;;  %v1960_v32 = vpop.f32.mrf.mxu1  ;;  %v4467_v56 = vld [vmem:[#allocation8 + $0x1c4] sm:$0xf]  ;;  %v4049_v3 = vor.u32 %v4463_v25, %v4046_v1  ;;  %v4038_v26 = vld [vmem:[#allocation8 + $0x198] sm:$0xf0] }
 0x15b   :  { %2585 = vmatpush.bf16.msrb.mxu2 %v3969_v2  ;;  %v4065_v59 = vor.u32 %v4467_v56, %v4062_v57  ;;  %v4041_v30 = vor.u32 %v4461_v5, %v4038_v26  ;;  %v4476_v57 = vld [vmem:[#allocation10 + $0x8] sm:$0xff] }
 0x15c   :  { %2560 = vmatmul.bf16.vlgmr.msrb.gmra.mxu0 %v4799_v46  ;;  %v1961_v46 = vadd.f32 %v1960_v32, %v1948_v31 }
 0x15d   :  { %2573 = vmatmul.bf16.vlgmr.msrb.gmra.mxu1 %v4797_v45  ;;  %v4060_v45 = vld [vmem:[#allocation8 + $0x1c0] sm:$0xf]  ;;  %2744 = vmatpush.bf16.msra.mxu0 %v4482_v40 }
 0x15e   :  { %v4061_v15 = vor.u32 %v4468_v14, %v4060_v45  ;;  %2757 = vmatpush.bf16.msra.mxu1 %v4490_v47 }
 0x160   :  { %2542 = vmatpush.bf16.msra.mxu3 %v4061_v15 }
 0x161   :  { %v1973_v10 = vpop.f32.mrf.mxu2  ;;  %v1949_v19 = vpop.f32.mrf.mxu0 }
 0x162   :  { %v1974_v12 = vadd.f32 %v1973_v10, %v1961_v46  ;;  %v1986_v13 = vpop.f32.mrf.mxu3  ;;  %v1962_v6 = vpop.f32.mrf.mxu1 }
 0x164   :  { %v1987_v18 = vadd.f32 %v1986_v13, %v1974_v12  ;;  %2543 = vmatpush.bf16.msra.mxu3 %v4053_v21 }
 0x166   :  { %vm2096_vm2 = vcmp.gt.f32.partialorder %v1987_v18, 0.0  ;;  %v2100_v20 = vmul.f32 0.2, %v1987_v18 }
 0x168   :  { %v2104_v22 = vsel %vm2096_vm2, %v1987_v18, %v2100_v20  ;;  %2544 = vmatpush.bf16.msra.mxu3 %v4045_v33 }
 0x169   :  { %v2108_v27 = vpack.c.bf16 %v2104_v22, %v2104_v22  ;;  %v1975_v28 = vpop.f32.mrf.mxu2 }
 0x16a   :  { %v1988_v29 = vpop.f32.mrf.mxu3 }
 0x16b   :  { %2534 = vmatmul.bf16.vlgmr.msra.gmra.mxu2 %v2108_v27 }
 0x16c   :  { %2545 = vmatpush.bf16.msra.mxu3 %v4037_v38  ;;  %v2177_v38 = vperm.slane %v2174_v23, 1 }
 0x170   :  { %2546 = vmatpush.bf16.msra.mxu3 %v4029_v43 }
 0x174   :  { %2591 = vmatpush.bf16.msrb.mxu3 %v4089_v44 }
 0x178   :  { %2592 = vmatpush.bf16.msrb.mxu3 %v4081_v35  ;;  %v4489_v35 = vld [vmem:[#allocation10 + $0x70] sm:$0xff] }
 0x179   :  { %v1999_v48 = vpop.f32.mrf.mxu0  ;;  %2758 = vmatpush.bf16.msra.mxu1 %v4489_v35 }
 0x17a   :  { %v2012_v50 = vpop.f32.mrf.mxu1  ;;  %v2000_v4 = vadd.f32 %v1999_v48, %v393_v60  ;;  %v4481_v48 = vld [vmem:[#allocation10 + $0x30] sm:$0xff]  ;;  %v4487_v60 = vld [vmem:[#allocation10 + $0x60] sm:$0xff] }
 0x17b   :  { %2586 = vmatmul.bf16.vlgmr.msrb.gmra.mxu2 %v2108_v27  ;;  %2745 = vmatpush.bf16.msra.mxu0 %v4481_v48 }
 0x17c   :  { %2593 = vmatpush.bf16.msrb.mxu3 %v4073_v53  ;;  %v2013_v31 = vadd.f32 %v2012_v50, %v2000_v4  ;;  %v4480_v50 = vld [vmem:[#allocation10 + $0x28] sm:$0xff] }
 0x17f   :  { %2746 = vmatpush.bf16.msra.mxu0 %v4480_v50 }
 0x180   :  { %2594 = vmatpush.bf16.msrb.mxu3 %v4065_v59  ;;  %v4475_v59 = vld [vmem:[#allocation10] sm:$0xff] }
 0x181   :  { %v2025_v52 = vpop.f32.mrf.mxu2  ;;  %v2001_v55 = vpop.f32.mrf.mxu0 }
 0x182   :  { %v2038_v54 = vpop.f32.mrf.mxu3  ;;  %v2014_v58 = vpop.f32.mrf.mxu1  ;;  %v2026_v32 = vadd.f32 %v2025_v52, %v2013_v31  ;;  %v4478_v52 = vld [vmem:[#allocation10 + $0x18] sm:$0xff] }
 0x183   :  { %2747 = vmatpush.bf16.msra.mxu0 %v4479_v51  ;;  %v4488_v58 = vld [vmem:[#allocation10 + $0x68] sm:$0xff] }
 0x184   :  { %2595 = vmatpush.bf16.msrb.mxu3 %v4057_v0  ;;  %v2039_v9 = vadd.f32 %v2038_v54, %v2026_v32  ;;  %v4477_v54 = vld [vmem:[#allocation10 + $0x10] sm:$0xff]  ;;  %2759 = vmatpush.bf16.msra.mxu1 %v4488_v58  ;;  %v4483_v0 = vld [vmem:[#allocation10 + $0x40] sm:$0xff] }
 0x187   :  { %2748 = vmatpush.bf16.msra.mxu0 %v4478_v52 }
 0x188   :  { %2596 = vmatpush.bf16.msrb.mxu3 %v4049_v3  ;;  %2760 = vmatpush.bf16.msra.mxu1 %v4487_v60 }
 0x189   :  { %v2027_v63 = vpop.f32.mrf.mxu2 }
 0x18a   :  { %v2040_v2 = vpop.f32.mrf.mxu3  ;;  %v4484_v63 = vld [vmem:[#allocation10 + $0x48] sm:$0xff] }
 0x18b   :  { %2749 = vmatpush.bf16.msra.mxu0 %v4477_v54 }
 0x18c   :  { %2597 = vmatpush.bf16.msrb.mxu3 %v4041_v30  ;;  %2761 = vmatpush.bf16.msra.mxu1 %v4486_v61 }
 0x18f   :  { %2750 = vmatpush.bf16.msra.mxu0 %v4476_v57 }
 0x190   :  { %2598 = vmatpush.bf16.msrb.mxu3 %v4033_v24  ;;  %2762 = vmatpush.bf16.msra.mxu1 %v4485_v62 }
 0x193   :  { %2751 = vmatpush.bf16.msra.mxu0 %v4475_v59 }
 0x194   :  { %2763 = vmatpush.bf16.msra.mxu1 %v4484_v63 }
 0x198   :  { %2764 = vmatpush.bf16.msra.mxu1 %v4483_v0 }
 0x199   :  { %v2051_v46 = vpop.f32.mrf.mxu0 }
 0x19a   :  { %v2064_v10 = vpop.f32.mrf.mxu1  ;;  %v2052_v12 = vadd.f32 %v2051_v46, %v2039_v9 }
 0x19c   :  { %v2065_v13 = vadd.f32 %v2064_v10, %v2052_v12  ;;  %v4503_v12 = vld [vmem:[%s4827_s6] ss:$0 sm:$0xff]  ;;  %s4672_s6 = smov [#allocation11]  }
 0x19d   :  { %s2796_s30 = sshll.u32 %s4672_s6, 4  ;;  %s2797_s30 = int_to_ptr.vmem [resolvable:$true] %s2796_s30 }
 0x1a1   :  { %v2077_v45 = vpop.f32.mrf.mxu2  ;;  %v2053_v16 = vpop.f32.mrf.mxu0 }
 0x1a2   :  { %v2078_v14 = vadd.f32 %v2077_v45, %v2065_v13  ;;  %v2090_v15 = vpop.f32.mrf.mxu3  ;;  %v2066_v17 = vpop.f32.mrf.mxu1 }
 0x1a4   :  { %v2091_v18 = vadd.f32 %v2090_v15, %v2078_v14 }
 0x1a6   :  { %vm2097_vm3 = vcmp.gt.f32.partialorder %v2091_v18, 0.0  ;;  %v2101_v19 = vmul.f32 0.2, %v2091_v18 }
 0x1a8   :  { %v2105_v6 = vsel %vm2097_vm3, %v2091_v18, %v2101_v19 }
 0x1a9   :  { %v2109_v20 = vpack.c.bf16 %v2105_v6, %v2105_v6  ;;  %v2079_v21 = vpop.f32.mrf.mxu2 }
 0x1aa   :  { %v2092_v22 = vpop.f32.mrf.mxu3 }
 0x1ab   :  { %2547 = vmatmul.bf16.vlgmr.msra.gmra.mxu3 %v2109_v20 }
 0x1b9   :  { %v2509_v27 = vpop.f32.mrf.mxu0 }
 0x1ba   :  { %v2510_v28 = vadd.f32 %v2509_v27, %v2176_v11  ;;  %v2522_v29 = vpop.f32.mrf.mxu1 }
 0x1bb   :  { %2599 = vmatmul.bf16.vlgmr.msrb.gmra.mxu3 %v2109_v20 }
 0x1bc   :  { %v2523_v33 = vadd.f32 %v2522_v29, %v2510_v28 }
 0x1c1   :  { %v2511_v39 = vpop.f32.mrf.mxu0 }
 0x1c2   :  { %v2524_v37 = vpop.f32.mrf.mxu1 }
 0x1d9   :  { %v2561_v34 = vpop.f32.mrf.mxu0 }
 0x1da   :  { %v2562_v41 = vadd.f32 %v2561_v34, %v2177_v38  ;;  %v2574_v43 = vpop.f32.mrf.mxu1 }
 0x1dc   :  { %v2575_v42 = vadd.f32 %v2574_v43, %v2562_v41 }
 0x1e1   :  { %v2563_v36 = vpop.f32.mrf.mxu0 }
 0x1e2   :  { %v2576_v44 = vpop.f32.mrf.mxu1 }
 0x1ee   :  { %v2535_v49 = vpop.f32.mrf.mxu2 }
 0x1ef   :  { %v2536_v25 = vadd.f32 %v2535_v49, %v2523_v33 }
 0x1f6   :  { %v2537_v53 = vpop.f32.mrf.mxu2 }
 0x1fe   :  { %v2587_v55 = vpop.f32.mrf.mxu2 }
 0x1ff   :  { %v2588_v30 = vadd.f32 %v2587_v55, %v2575_v42 }
 0x206   :  { %v2589_v56 = vpop.f32.mrf.mxu2 }
 0x22e   :  { %v2548_v1 = vpop.f32.mrf.mxu3 }
 0x22f   :  { %v2549_v2 = vadd.f32 %v2548_v1, %v2536_v25 }
 0x231   :  { %vm2604_vm4 = vcmp.gt.f32.partialorder %v2549_v2, 0.0  ;;  %v2606_v3 = vmul.f32 0.2, %v2549_v2 }
 0x233   :  { %v2608_v4 = vsel %vm2604_vm4, %v2549_v2, %v2606_v3 }
 0x234   :  { %v2610_v5 = vpack.c.bf16 %v2608_v4, %v2608_v4 }
 0x236   :  { %v2550_v26 = vpop.f32.mrf.mxu3  ;;  %2752 = vmatmul.bf16.vlgmr.msra.gmra.mxu0 %v2610_v5 }
 0x23e   :  { %v2600_v31 = vpop.f32.mrf.mxu3 }
 0x23f   :  { %v2601_v32 = vadd.f32 %v2600_v31, %v2588_v30 }
 0x241   :  { %vm2605_vm5 = vcmp.gt.f32.partialorder %v2601_v32, 0.0  ;;  %v2607_v7 = vmul.f32 0.2, %v2601_v32 }
 0x243   :  { %v2609_v8 = vsel %vm2605_vm5, %v2601_v32, %v2607_v7 }
 0x244   :  { %v2611_v24 = vpack.c.bf16 %v2609_v8, %v2609_v8 }
 0x246   :  { %v2602_v9 = vpop.f32.mrf.mxu3  ;;  %2765 = vmatmul.bf16.vlgmr.msra.gmra.mxu1 %v2611_v24 }
 0x2b3   :  { %v2753_v46 = vpop.f32.mrf.mxu0 }
 0x2b4   :  { %v2754_v13 = vadd.f32 %v4503_v12, %v2753_v46 }
 0x2bb   :  { %v2755_v10 = vpop.f32.mrf.mxu0 }
 0x2c3   :  { %v2766_v45 = vpop.f32.mrf.mxu1 }
 0x2c4   :  { %v2767_v14 = vadd.f32 %v2766_v45, %v2754_v13 }
 0x2c6   :  { %v4154_v15 = vmul.f32 -1.442695, %v2767_v14 }
 0x2c8   :  { %4504 = vpow2.f32 %v4154_v15 }
 0x2cb   :  { %v2768_v16 = vpop.f32.mrf.mxu1 }
 0x2ce   :  { %v4505_v17 = vpop.eup %4504 }
 0x2cf   :  { %v2773_v18 = vadd.f32 1.0, %v4505_v17 }
 0x2d1   :  { %4506 = vrcp.f32 %v2773_v18  ;;  %v2785_v21 = vand.u32 2147483648, %v2773_v18  ;;  %v2783_v23 = vand.u32 2147483647, %v2773_v18  ;;  %vm2779_vm7 = vweird.f32 %v2773_v18 }
 0x2d3   :  { %v2786_v27 = vor.u32 1.1754944e-38, %v2785_v21  ;;  %vm2784_vm9 = vcmp.eq.f32.partialorder %v2783_v23, 8.507059e+37 }
 0x2d7   :  { %v4507_v19 = vpop.eup %4506 }
 0x2d8   :  { %v2775_v6 = vmul.f32 %v4507_v19, %v2773_v18  ;;  %vm2780_vm6 = vweird.f32 %v4507_v19 }
 0x2d9   :  { %vm2781_vm8 = vmor %vm2779_vm7, %vm2780_vm6 }
 0x2da   :  { %v2776_v20 = vsub.f32 1.0, %v2775_v6 }
 0x2dc   :  { %v2777_v22 = vmul.f32 %v4507_v19, %v2776_v20 }
 0x2de   :  { %v2778_v11 = vadd.f32 %v4507_v19, %v2777_v22 }
 0x2e0   :  { %v2782_v28 = vsel %vm2781_vm8, %v4507_v19, %v2778_v11 }
 0x2e1   :  { %v2787_v29 = vsel %vm2784_vm9, %v2786_v27, %v2782_v28 }
 0x2e2   :  { %v2789_v33 = vpack.c.bf16 %v2787_v29, %v2787_v29 }
 0x2e4   :  { %2790 = vst [vmem:[#allocation11] sm:$0x1] %v2789_v33 }
 0x2e5   :  { %2801 = dma.vmem_to_hbm [thread:$0]  %s2797_s30, 16, %s2799_s10, [#allocation4]  }
 0x2e6   :  { %4659 = dma.done.wait [#allocation4], 16  }
 0x2e7   :  { %4660 = vsyncadd [#allocation4], 4294967280 }
 0x2e8   :  { %2806 = vsyncpa [#allocation3], 1 }
 0x2e9   :  { %2807 = vsyncpa [#allocation6], 1 }
 0x2ea   :  { %2808 = vsyncpa [#allocation9], 1 }
 0x2eb   :  { %2809 = vsyncpa [#allocation4], 1 }

</bundles_post_ra>
